<compile_context>
chip_gen: v6e
topology: v6e:2x2x1
jax: 0.10.0
libtpu: 0.0.40
codegen_flags: <defaults>
</compile_context>

<pallas_src>
import jax
import jax.numpy as jnp
from jax import lax
from jax.experimental import pallas as pl
from jax.experimental.pallas import tpu as pltpu

EPS = 1e-5  # PyTorch nn.LayerNorm default


def _layernorm(h, gamma, beta):
    mu = jnp.mean(h, axis=-1, keepdims=True)
    var = jnp.mean((h - mu) ** 2, axis=-1, keepdims=True)
    return (h - mu) * lax.rsqrt(var + EPS) * gamma + beta


def _make_kernel(store_attn):
    def kernel(xq_ref, kv_ref, w1_ref, b1_ref, w2_ref, b2_ref,
               g1_ref, be1_ref, g2_ref, be2_ref, *out_refs):
        out_ref = out_refs[0]
        xq = xq_ref[0]                      # (TQ, D) f32 query tile
        kv = kv_ref[0]                      # (L,  D) bf16 K/V (pre-cast in wrapper)
        D = xq.shape[-1]
        scale = 1.0 / jnp.sqrt(jnp.float32(D))

        q_bf = xq.astype(jnp.bfloat16)      # small (TQ, D) cast only

        # --- attention scores: contract last axes (no XLU transpose) --------
        s = lax.dot_general(q_bf, kv, (((1,), (1,)), ((), ())),
                            preferred_element_type=jnp.float32) * scale   # (TQ, L)
        s = s - jnp.max(s, axis=-1, keepdims=True)
        e = jnp.exp(s)
        # approx reciprocal (EUP slot): rows sum to ~1, not exactly 1.
        inv = pl.reciprocal(jnp.sum(e, axis=-1, keepdims=True), approx=True)
        attn = e * inv                                                     # (TQ, L)
        attn_bf = attn.astype(jnp.bfloat16)  # single cast, reused below
        new_x = jnp.dot(attn_bf, kv, preferred_element_type=jnp.float32)  # (TQ, D)

        # --- x = norm1(x + dropout(new_x))  (dropout == identity) -----------
        xn = _layernorm(xq + new_x, g1_ref[0], be1_ref[0])                 # (TQ, D)

        # --- position-wise FFN: conv1(1x1) -> relu -> conv2(1x1) ------------
        h = jnp.dot(xn.astype(jnp.bfloat16), w1_ref[...],
                    preferred_element_type=jnp.float32) + b1_ref[0]
        h = jnp.maximum(h, 0.0)
        y = jnp.dot(h.astype(jnp.bfloat16), w2_ref[...],
                    preferred_element_type=jnp.float32) + b2_ref[0]

        # --- out = norm2(x + y) ----------------------------------------------
        out_ref[0] = _layernorm(xn + y, g2_ref[0], be2_ref[0]).astype(out_ref.dtype)

        if store_attn:
            attn_ref = out_refs[1]
            if attn_ref.dtype == jnp.bfloat16:
                attn_ref[0] = attn_bf          # reuse the existing bf16 cast
            else:
                attn_ref[0] = attn.astype(attn_ref.dtype)

    return kernel


def _vmem_budgets():
    """(tile-picker budget, vmem_limit_bytes) derived from this chip's VMEM."""
    try:
        cap = int(pltpu.get_tpu_info().vmem_capacity_bytes)
    except Exception:
        cap = 64 * 1024 * 1024           # conservative (v7x-sized) fallback
    # ~62.5% for the picker, ~75% for the compiler limit:
    #   v7x (64 MiB): 40 / 48 MiB;  v5e/v6e (128 MiB): 80 / 96 MiB.
    return (cap * 5) // 8, (cap * 3) // 4


def _pick_tq(L, D, d_ff, attn_bytes, budget, store_attn):
    """Largest MXU-friendly query tile (>=128, divisor of L) fitting the budget."""
    def vmem_est(tq):
        blocks = (2 * tq * D * 4             # f32 query tile (double-buffered)
                  + 2 * L * D * 2            # bf16 K/V block (double-buffered)
                  + 2 * tq * D * 4)          # f32 output tile (double-buffered)
        if store_attn:
            blocks += 2 * tq * L * attn_bytes
        # live intermediates: s & e (f32), bf16 attn, bf16 q, f32 FFN hidden
        interm = 2 * tq * L * 4 + tq * L * 2 + tq * D * 2 + tq * d_ff * 4
        # constants are single-buffered (pl.Buffered(1))
        weights = D * d_ff * 2 + d_ff * D * 2 + (d_ff + 5 * D) * 4
        return blocks + interm + weights

    if L <= 128:
        return L                              # whole sequence in one tile
    cands = sorted({d for d in range(128, L, 8) if L % d == 0} | {L},
                   reverse=True)
    for tq in cands:
        if vmem_est(tq) <= budget:
            return tq
    # Nothing fits: use the smallest MXU-friendly (>=128) divisor rather than
    # shrinking the MXU M dimension further or falling back to untiled L.
    # TODO(synk): stream K/V with an inner online-softmax pipeline instead.
    return cands[-1]


def encoder_layer(x, params, *, tq=None, attn_dtype=jnp.bfloat16,
                  return_attn=True, single_buffer_consts=True):
    """EncoderLayer forward.

    Returns (out, attn) if return_attn else out.  attn defaults to bf16 since
    the (B, L, L) writeback dominates HBM traffic; pass attn_dtype=jnp.float32
    for closer numerical parity with the f32 PyTorch module.
    """
    B, L, D = x.shape
    d_ff = params["w1"].shape[1]

    x = x.astype(jnp.float32)
    kv = x.astype(jnp.bfloat16)               # pre-cast K/V once, outside the kernel
    w1 = params["w1"].astype(jnp.bfloat16)    # bf16 MXU weights (half the VMEM)
    w2 = params["w2"].astype(jnp.bfloat16)

    attn_bytes = jnp.dtype(attn_dtype).itemsize
    budget, vmem_limit = _vmem_budgets()
    if tq is None:
        tq = _pick_tq(L, D, d_ff, attn_bytes, budget, return_attn)
    assert L % tq == 0, "query tile must divide sequence length"
    nq = L // tq

    flops = 4 * B * L * L * D + 4 * B * L * D * d_ff
    bytes_accessed = (B * L * D * (4 + 2 + 4)              # x in, kv in, out
                      + (B * L * L * attn_bytes if return_attn else 0)
                      + 2 * D * d_ff * 2 + (d_ff + 5 * D) * 4)
    cost = pl.CostEstimate(flops=flops, transcendentals=B * L * L,
                           bytes_accessed=bytes_accessed)

    out_shape = jax.ShapeDtypeStruct((B, L, D), jnp.float32)
    out_specs = pl.BlockSpec((1, tq, D), lambda b, q: (b, q, 0))
    if return_attn:
        out_shape = (out_shape, jax.ShapeDtypeStruct((B, L, L), attn_dtype))
        out_specs = (out_specs, pl.BlockSpec((1, tq, L), lambda b, q: (b, q, 0)))

    operands = (x, kv, w1, params["b1"], w2, params["b2"],
                params["g1"], params["be1"], params["g2"], params["be2"])

    def _invoke(buffer_consts_once):
        def const_spec(shape):
            idx = lambda b, q: (0,) * len(shape)
            if buffer_consts_once:
                # Never re-DMA'd blocks: single-buffer to free VMEM for a bigger TQ.
                return pl.BlockSpec(shape, idx, pipeline_mode=pl.Buffered(1))
            return pl.BlockSpec(shape, idx)

        in_specs = [
            pl.BlockSpec((1, tq, D), lambda b, q: (b, q, 0)),   # f32 query tile
            pl.BlockSpec((1, L, D), lambda b, q: (b, 0, 0)),    # bf16 K/V, per-batch
            const_spec((D, d_ff)),                              # conv1 weight (bf16)
            const_spec((1, d_ff)),                              # conv1 bias
            const_spec((d_ff, D)),                              # conv2 weight (bf16)
            const_spec((1, D)),                                 # conv2 bias
            const_spec((1, D)),                                 # norm1 gamma
            const_spec((1, D)),                                 # norm1 beta
            const_spec((1, D)),                                 # norm2 gamma
            const_spec((1, D)),                                 # norm2 beta
        ]
        return pl.pallas_call(
            _make_kernel(return_attn),
            out_shape=out_shape,
            grid=(B, nq),
            in_specs=in_specs,
            out_specs=out_specs,
            compiler_params=pltpu.CompilerParams(
                dimension_semantics=("parallel", "parallel"),
                vmem_limit_bytes=int(vmem_limit)),
            cost_estimate=cost,
        )(*operands)

    if single_buffer_consts:
        try:
            return _invoke(True)
        except Exception:   # older JAX w/o pipeline_mode support: safe fallback
            pass
    return _invoke(False)


def encoder_layer_ref(x, params, matmul_dtype=jnp.float32):
    """Pure-JAX reference.  matmul_dtype=bf16 mirrors the kernel's MXU casts."""
    D = x.shape[-1]
    cast = lambda a: a.astype(matmul_dtype)
    s = jnp.einsum("bld,bmd->blm", cast(x), cast(x),
                   preferred_element_type=jnp.float32) / jnp.sqrt(jnp.float32(D))
    attn = jax.nn.softmax(s, axis=-1)
    new_x = jnp.einsum("blm,bmd->bld", cast(attn), cast(x),
                       preferred_element_type=jnp.float32)
    xn = _layernorm(x + new_x, params["g1"][0], params["be1"][0])
    h = jnp.maximum(
        jnp.einsum("bld,df->blf", cast(xn), cast(params["w1"]),
                   preferred_element_type=jnp.float32) + params["b1"][0], 0.0)
    y = jnp.einsum("blf,fd->bld", cast(h), cast(params["w2"]),
                   preferred_element_type=jnp.float32) + params["b2"][0]
    out = _layernorm(xn + y, params["g2"][0], params["be2"][0])
    return out, attn


def make_params(key, d_model, d_ff):
    ks = jax.random.split(key, 4)
    # PyTorch Conv1d weights are (out_c, in_c, 1); stored transposed for matmul.
    w1 = jax.random.normal(ks[0], (d_model, d_ff), jnp.float32) * 0.05
    b1 = jax.random.normal(ks[1], (1, d_ff), jnp.float32) * 0.05
    w2 = jax.random.normal(ks[2], (d_ff, d_model), jnp.float32) * 0.05
    b2 = jax.random.normal(ks[3], (1, d_model), jnp.float32) * 0.05
    return dict(
        w1=w1, b1=b1, w2=w2, b2=b2,
        g1=jnp.ones((1, d_model), jnp.float32),
        be1=jnp.zeros((1, d_model), jnp.float32),
        g2=jnp.ones((1, d_model), jnp.float32),
        be2=jnp.zeros((1, d_model), jnp.float32),
    )


if __name__ == "__main__":
    key = jax.random.PRNGKey(0)
    kx, kp, kx2, kp2 = jax.random.split(key, 4)

    # --- test 1: small spec-sized shapes, default bf16 attention output ------
    B, L, D = 2, 8, 32
    d_ff = 4 * D
    x = jax.random.normal(kx, (B, L, D), jnp.float32)
    params = make_params(kp, D, d_ff)

    out, attn = jax.block_until_ready(encoder_layer(x, params))

    # Mirrored-precision reference (same bf16 MXU casts) -> tight check.
    out_m, attn_m = encoder_layer_ref(x, params, matmul_dtype=jnp.bfloat16)
    assert jnp.allclose(out, out_m, atol=1e-2, rtol=1e-2)
    assert jnp.allclose(attn.astype(jnp.float32), attn_m, atol=1e-2, rtol=1e-2)
    # Full-f32 reference -> loose sanity check on the bf16-MXU precision loss.
    out_f, attn_f = encoder_layer_ref(x, params, matmul_dtype=jnp.float32)
    assert jnp.allclose(out, out_f, atol=1e-1, rtol=1e-1)
    assert jnp.allclose(attn.astype(jnp.float32), attn_f, atol=1e-1, rtol=1e-1)

    # attn-free path: skips the (B, L, L) writeback entirely.
    out_na = jax.block_until_ready(encoder_layer(x, params, return_attn=False))
    assert jnp.allclose(out_na, out, atol=1e-3, rtol=1e-3)

    # --- test 2: 128-aligned shapes, explicit query tiling, f32 attn output --
    B2, L2, D2 = 1, 256, 128
    d_ff2 = 2 * D2
    x2 = jax.random.normal(kx2, (B2, L2, D2), jnp.float32)
    params2 = make_params(kp2, D2, d_ff2)

    out2, attn2 = jax.block_until_ready(
        encoder_layer(x2, params2, tq=128, attn_dtype=jnp.float32))
    out2_m, attn2_m = encoder_layer_ref(x2, params2, matmul_dtype=jnp.bfloat16)
    assert jnp.allclose(out2, out2_m, atol=1e-2, rtol=1e-2)
    assert jnp.allclose(attn2, attn2_m, atol=1e-2, rtol=1e-2)

    print("KERNEL_OK")
</pallas_src>

<mosaic_0001>
module attributes {stable_mosaic.version = 11 : i64} {
  func.func @kernel(%arg0: i32, %arg1: i32, %arg2: memref<1x8x32xf32, #tpu.memory_space<vmem>>, %arg3: memref<1x8x32xbf16, #tpu.memory_space<vmem>>, %arg4: memref<32x128xbf16, #tpu.memory_space<vmem>>, %arg5: memref<1x128xf32, #tpu.memory_space<vmem>>, %arg6: memref<128x32xbf16, #tpu.memory_space<vmem>>, %arg7: memref<1x32xf32, #tpu.memory_space<vmem>>, %arg8: memref<1x32xf32, #tpu.memory_space<vmem>>, %arg9: memref<1x32xf32, #tpu.memory_space<vmem>>, %arg10: memref<1x32xf32, #tpu.memory_space<vmem>>, %arg11: memref<1x32xf32, #tpu.memory_space<vmem>>, %arg12: memref<1x8x32xf32, #tpu.memory_space<vmem>>, %arg13: memref<1x8x8xbf16, #tpu.memory_space<vmem>>) attributes {dimension_semantics = [#tpu.dimension_semantics<parallel>, #tpu.dimension_semantics<parallel>], iteration_bounds = array<i64: 2, 1>, scalar_prefetch = 0 : i64, scratch_operands = 0 : i64, tpu.core_type = #tpu.core_type<tc>, window_params = [{transform_indices = @transform_0, window_bounds = array<i64: 1, 8, 32>}, {transform_indices = @transform_1, window_bounds = array<i64: 1, 8, 32>}, {pipeline_mode = #tpu.pipeline_mode<synchronous>, transform_indices = @transform_2, window_bounds = array<i64: 32, 128>}, {pipeline_mode = #tpu.pipeline_mode<synchronous>, transform_indices = @transform_3, window_bounds = array<i64: 1, 128>}, {pipeline_mode = #tpu.pipeline_mode<synchronous>, transform_indices = @transform_4, window_bounds = array<i64: 128, 32>}, {pipeline_mode = #tpu.pipeline_mode<synchronous>, transform_indices = @transform_5, window_bounds = array<i64: 1, 32>}, {pipeline_mode = #tpu.pipeline_mode<synchronous>, transform_indices = @transform_6, window_bounds = array<i64: 1, 32>}, {pipeline_mode = #tpu.pipeline_mode<synchronous>, transform_indices = @transform_7, window_bounds = array<i64: 1, 32>}, {pipeline_mode = #tpu.pipeline_mode<synchronous>, transform_indices = @transform_8, window_bounds = array<i64: 1, 32>}, {pipeline_mode = #tpu.pipeline_mode<synchronous>, transform_indices = @transform_9, window_bounds = array<i64: 1, 32>}, {transform_indices = @transform_10, window_bounds = array<i64: 1, 8, 32>}, {transform_indices = @transform_11, window_bounds = array<i64: 1, 8, 8>}]} {
    %c0 = arith.constant 0 : index
    %c0_0 = arith.constant 0 : index
    %c0_1 = arith.constant 0 : index
    %0 = vector.load %arg2[%c0, %c0_0, %c0_1] : memref<1x8x32xf32, #tpu.memory_space<vmem>>, vector<1x8x32xf32>
    %1 = vector.shape_cast %0 : vector<1x8x32xf32> to vector<8x32xf32>
    %c0_2 = arith.constant 0 : index
    %c0_3 = arith.constant 0 : index
    %c0_4 = arith.constant 0 : index
    %2 = vector.load %arg3[%c0_2, %c0_3, %c0_4] : memref<1x8x32xbf16, #tpu.memory_space<vmem>>, vector<1x8x32xbf16>
    %3 = vector.shape_cast %2 : vector<1x8x32xbf16> to vector<8x32xbf16>
    %cst = arith.constant 3.200000e+01 : f32
    %4 = math.sqrt %cst : f32
    %cst_5 = arith.constant 1.000000e+00 : f32
    %5 = arith.divf %cst_5, %4 : f32
    %6 = arith.truncf %1 : vector<8x32xf32> to vector<8x32xbf16>
    %cst_6 = arith.constant dense<0.000000e+00> : vector<8x8xf32>
    %7 = tpu.matmul %6, %3, %cst_6 {dimension_numbers = #tpu.dot_dimension_numbers<[1], [1], [0], [0], [0, 0, 1, 0], [], []>} : vector<8x32xbf16>, vector<8x32xbf16>, vector<8x8xf32> -> vector<8x8xf32>
    %8 = vector.broadcast %5 : f32 to vector<8x8xf32>
    %9 = arith.mulf %7, %8 : vector<8x8xf32>
    %cst_7 = arith.constant dense<0xFF800000> : vector<8xf32>
    %10 = vector.multi_reduction <maximumf>, %9, %cst_7 [1] : vector<8x8xf32> to vector<8xf32>
    %11 = vector.shape_cast %10 : vector<8xf32> to vector<8x1xf32>
    %12 = vector.broadcast %11 : vector<8x1xf32> to vector<8x8xf32>
    %13 = arith.subf %9, %12 : vector<8x8xf32>
    %14 = math.exp %13 : vector<8x8xf32>
    %cst_8 = arith.constant dense<0.000000e+00> : vector<8xf32>
    %15 = vector.multi_reduction <add>, %14, %cst_8 [1] : vector<8x8xf32> to vector<8xf32>
    %16 = vector.shape_cast %15 : vector<8xf32> to vector<8x1xf32>
    %17 = tpu.reciprocal %16 {approx = true} : vector<8x1xf32> -> vector<8x1xf32>
    %18 = vector.broadcast %17 : vector<8x1xf32> to vector<8x8xf32>
    %19 = arith.mulf %14, %18 : vector<8x8xf32>
    %20 = arith.truncf %19 : vector<8x8xf32> to vector<8x8xbf16>
    %cst_9 = arith.constant dense<0.000000e+00> : vector<8x32xf32>
    %21 = tpu.matmul %20, %3, %cst_9 {dimension_numbers = #tpu.dot_dimension_numbers<[1], [0], [0], [1], [0, 0, 1, 1], [], []>} : vector<8x8xbf16>, vector<8x32xbf16>, vector<8x32xf32> -> vector<8x32xf32>
    %22 = arith.addf %1, %21 : vector<8x32xf32>
    %c0_10 = arith.constant 0 : index
    %c0_11 = arith.constant 0 : index
    %23 = vector.load %arg8[%c0_10, %c0_11] : memref<1x32xf32, #tpu.memory_space<vmem>>, vector<1x32xf32>
    %24 = vector.shape_cast %23 : vector<1x32xf32> to vector<32xf32>
    %c0_12 = arith.constant 0 : index
    %c0_13 = arith.constant 0 : index
    %25 = vector.load %arg9[%c0_12, %c0_13] : memref<1x32xf32, #tpu.memory_space<vmem>>, vector<1x32xf32>
    %26 = vector.shape_cast %25 : vector<1x32xf32> to vector<32xf32>
    %cst_14 = arith.constant dense<0.000000e+00> : vector<8xf32>
    %27 = vector.multi_reduction <add>, %22, %cst_14 [1] : vector<8x32xf32> to vector<8xf32>
    %28 = vector.shape_cast %27 : vector<8xf32> to vector<8x1xf32>
    %cst_15 = arith.constant 3.200000e+01 : f32
    %29 = vector.broadcast %cst_15 : f32 to vector<8x1xf32>
    %30 = arith.divf %28, %29 : vector<8x1xf32>
    %31 = vector.broadcast %30 : vector<8x1xf32> to vector<8x32xf32>
    %32 = arith.subf %22, %31 : vector<8x32xf32>
    %33 = arith.mulf %32, %32 : vector<8x32xf32>
    %cst_16 = arith.constant dense<0.000000e+00> : vector<8xf32>
    %34 = vector.multi_reduction <add>, %33, %cst_16 [1] : vector<8x32xf32> to vector<8xf32>
    %35 = vector.shape_cast %34 : vector<8xf32> to vector<8x1xf32>
    %cst_17 = arith.constant 3.200000e+01 : f32
    %36 = vector.broadcast %cst_17 : f32 to vector<8x1xf32>
    %37 = arith.divf %35, %36 : vector<8x1xf32>
    %38 = vector.broadcast %30 : vector<8x1xf32> to vector<8x32xf32>
    %39 = arith.subf %22, %38 : vector<8x32xf32>
    %cst_18 = arith.constant 9.99999974E-6 : f32
    %40 = vector.broadcast %cst_18 : f32 to vector<8x1xf32>
    %41 = arith.addf %37, %40 : vector<8x1xf32>
    %42 = math.rsqrt %41 : vector<8x1xf32>
    %43 = vector.broadcast %42 : vector<8x1xf32> to vector<8x32xf32>
    %44 = arith.mulf %39, %43 : vector<8x32xf32>
    %45 = vector.shape_cast %24 : vector<32xf32> to vector<1x32xf32>
    %46 = vector.broadcast %45 : vector<1x32xf32> to vector<8x32xf32>
    %47 = arith.mulf %44, %46 : vector<8x32xf32>
    %48 = vector.shape_cast %26 : vector<32xf32> to vector<1x32xf32>
    %49 = vector.broadcast %48 : vector<1x32xf32> to vector<8x32xf32>
    %50 = arith.addf %47, %49 : vector<8x32xf32>
    %51 = arith.truncf %50 : vector<8x32xf32> to vector<8x32xbf16>
    %c0_19 = arith.constant 0 : index
    %c0_20 = arith.constant 0 : index
    %52 = vector.load %arg4[%c0_19, %c0_20] : memref<32x128xbf16, #tpu.memory_space<vmem>>, vector<32x128xbf16>
    %cst_21 = arith.constant dense<0.000000e+00> : vector<8x128xf32>
    %53 = tpu.matmul %51, %52, %cst_21 {dimension_numbers = #tpu.dot_dimension_numbers<[1], [0], [0], [1], [0, 0, 1, 1], [], []>} : vector<8x32xbf16>, vector<32x128xbf16>, vector<8x128xf32> -> vector<8x128xf32>
    %c0_22 = arith.constant 0 : index
    %c0_23 = arith.constant 0 : index
    %54 = vector.load %arg5[%c0_22, %c0_23] : memref<1x128xf32, #tpu.memory_space<vmem>>, vector<1x128xf32>
    %55 = vector.shape_cast %54 : vector<1x128xf32> to vector<128xf32>
    %56 = vector.shape_cast %55 : vector<128xf32> to vector<1x128xf32>
    %57 = vector.broadcast %56 : vector<1x128xf32> to vector<8x128xf32>
    %58 = arith.addf %53, %57 : vector<8x128xf32>
    %cst_24 = arith.constant 0.000000e+00 : f32
    %59 = vector.broadcast %cst_24 : f32 to vector<8x128xf32>
    %60 = arith.maximumf %58, %59 : vector<8x128xf32>
    %61 = arith.truncf %60 : vector<8x128xf32> to vector<8x128xbf16>
    %c0_25 = arith.constant 0 : index
    %c0_26 = arith.constant 0 : index
    %62 = vector.load %arg6[%c0_25, %c0_26] : memref<128x32xbf16, #tpu.memory_space<vmem>>, vector<128x32xbf16>
    %cst_27 = arith.constant dense<0.000000e+00> : vector<8x32xf32>
    %63 = tpu.matmul %61, %62, %cst_27 {dimension_numbers = #tpu.dot_dimension_numbers<[1], [0], [0], [1], [0, 0, 1, 1], [], []>} : vector<8x128xbf16>, vector<128x32xbf16>, vector<8x32xf32> -> vector<8x32xf32>
    %c0_28 = arith.constant 0 : index
    %c0_29 = arith.constant 0 : index
    %64 = vector.load %arg7[%c0_28, %c0_29] : memref<1x32xf32, #tpu.memory_space<vmem>>, vector<1x32xf32>
    %65 = vector.shape_cast %64 : vector<1x32xf32> to vector<32xf32>
    %66 = vector.shape_cast %65 : vector<32xf32> to vector<1x32xf32>
    %67 = vector.broadcast %66 : vector<1x32xf32> to vector<8x32xf32>
    %68 = arith.addf %63, %67 : vector<8x32xf32>
    %69 = arith.addf %50, %68 : vector<8x32xf32>
    %c0_30 = arith.constant 0 : index
    %c0_31 = arith.constant 0 : index
    %70 = vector.load %arg10[%c0_30, %c0_31] : memref<1x32xf32, #tpu.memory_space<vmem>>, vector<1x32xf32>
    %71 = vector.shape_cast %70 : vector<1x32xf32> to vector<32xf32>
    %c0_32 = arith.constant 0 : index
    %c0_33 = arith.constant 0 : index
    %72 = vector.load %arg11[%c0_32, %c0_33] : memref<1x32xf32, #tpu.memory_space<vmem>>, vector<1x32xf32>
    %73 = vector.shape_cast %72 : vector<1x32xf32> to vector<32xf32>
    %cst_34 = arith.constant dense<0.000000e+00> : vector<8xf32>
    %74 = vector.multi_reduction <add>, %69, %cst_34 [1] : vector<8x32xf32> to vector<8xf32>
    %75 = vector.shape_cast %74 : vector<8xf32> to vector<8x1xf32>
    %cst_35 = arith.constant 3.200000e+01 : f32
    %76 = vector.broadcast %cst_35 : f32 to vector<8x1xf32>
    %77 = arith.divf %75, %76 : vector<8x1xf32>
    %78 = vector.broadcast %77 : vector<8x1xf32> to vector<8x32xf32>
    %79 = arith.subf %69, %78 : vector<8x32xf32>
    %80 = arith.mulf %79, %79 : vector<8x32xf32>
    %cst_36 = arith.constant dense<0.000000e+00> : vector<8xf32>
    %81 = vector.multi_reduction <add>, %80, %cst_36 [1] : vector<8x32xf32> to vector<8xf32>
    %82 = vector.shape_cast %81 : vector<8xf32> to vector<8x1xf32>
    %cst_37 = arith.constant 3.200000e+01 : f32
    %83 = vector.broadcast %cst_37 : f32 to vector<8x1xf32>
    %84 = arith.divf %82, %83 : vector<8x1xf32>
    %85 = vector.broadcast %77 : vector<8x1xf32> to vector<8x32xf32>
    %86 = arith.subf %69, %85 : vector<8x32xf32>
    %cst_38 = arith.constant 9.99999974E-6 : f32
    %87 = vector.broadcast %cst_38 : f32 to vector<8x1xf32>
    %88 = arith.addf %84, %87 : vector<8x1xf32>
    %89 = math.rsqrt %88 : vector<8x1xf32>
    %90 = vector.broadcast %89 : vector<8x1xf32> to vector<8x32xf32>
    %91 = arith.mulf %86, %90 : vector<8x32xf32>
    %92 = vector.shape_cast %71 : vector<32xf32> to vector<1x32xf32>
    %93 = vector.broadcast %92 : vector<1x32xf32> to vector<8x32xf32>
    %94 = arith.mulf %91, %93 : vector<8x32xf32>
    %95 = vector.shape_cast %73 : vector<32xf32> to vector<1x32xf32>
    %96 = vector.broadcast %95 : vector<1x32xf32> to vector<8x32xf32>
    %97 = arith.addf %94, %96 : vector<8x32xf32>
    %c0_39 = arith.constant 0 : index
    %c0_40 = arith.constant 0 : index
    %c0_41 = arith.constant 0 : index
    %98 = vector.load %arg12[%c0_39, %c0_40, %c0_41] : memref<1x8x32xf32, #tpu.memory_space<vmem>>, vector<1x8x32xf32>
    %99 = vector.shape_cast %98 : vector<1x8x32xf32> to vector<8x32xf32>
    %100 = vector.shape_cast %97 : vector<8x32xf32> to vector<1x8x32xf32>
    tpu.vector_store %arg12[%c0_39, %c0_40, %c0_41], %100 {strides = array<i32>} : memref<1x8x32xf32, #tpu.memory_space<vmem>>, vector<1x8x32xf32>,
    %c0_42 = arith.constant 0 : index
    %c0_43 = arith.constant 0 : index
    %c0_44 = arith.constant 0 : index
    %101 = vector.load %arg13[%c0_42, %c0_43, %c0_44] : memref<1x8x8xbf16, #tpu.memory_space<vmem>>, vector<1x8x8xbf16>
    %102 = vector.shape_cast %101 : vector<1x8x8xbf16> to vector<8x8xbf16>
    %103 = vector.shape_cast %20 : vector<8x8xbf16> to vector<1x8x8xbf16>
    tpu.vector_store %arg13[%c0_42, %c0_43, %c0_44], %103 {strides = array<i32>} : memref<1x8x8xbf16, #tpu.memory_space<vmem>>, vector<1x8x8xbf16>,
    return
  }
  func.func @transform_0(%arg0: i32, %arg1: i32) -> (i32, i32, i32) {
    %c0_i32 = arith.constant 0 : i32
    %c0_i32_0 = arith.constant 0 : i32
    return %arg0, %arg1, %c0_i32 : i32, i32, i32
  }
  func.func @transform_1(%arg0: i32, %arg1: i32) -> (i32, i32, i32) {
    %c0_i32 = arith.constant 0 : i32
    %c0_i32_0 = arith.constant 0 : i32
    %c0_i32_1 = arith.constant 0 : i32
    return %arg0, %c0_i32, %c0_i32_0 : i32, i32, i32
  }
  func.func @transform_2(%arg0: i32, %arg1: i32) -> (i32, i32) {
    %c0_i32 = arith.constant 0 : i32
    %c0_i32_0 = arith.constant 0 : i32
    %c0_i32_1 = arith.constant 0 : i32
    return %c0_i32, %c0_i32_0 : i32, i32
  }
  func.func @transform_3(%arg0: i32, %arg1: i32) -> (i32, i32) {
    %c0_i32 = arith.constant 0 : i32
    %c0_i32_0 = arith.constant 0 : i32
    %c0_i32_1 = arith.constant 0 : i32
    return %c0_i32, %c0_i32_0 : i32, i32
  }
  func.func @transform_4(%arg0: i32, %arg1: i32) -> (i32, i32) {
    %c0_i32 = arith.constant 0 : i32
    %c0_i32_0 = arith.constant 0 : i32
    %c0_i32_1 = arith.constant 0 : i32
    return %c0_i32, %c0_i32_0 : i32, i32
  }
  func.func @transform_5(%arg0: i32, %arg1: i32) -> (i32, i32) {
    %c0_i32 = arith.constant 0 : i32
    %c0_i32_0 = arith.constant 0 : i32
    %c0_i32_1 = arith.constant 0 : i32
    return %c0_i32, %c0_i32_0 : i32, i32
  }
  func.func @transform_6(%arg0: i32, %arg1: i32) -> (i32, i32) {
    %c0_i32 = arith.constant 0 : i32
    %c0_i32_0 = arith.constant 0 : i32
    %c0_i32_1 = arith.constant 0 : i32
    return %c0_i32, %c0_i32_0 : i32, i32
  }
  func.func @transform_7(%arg0: i32, %arg1: i32) -> (i32, i32) {
    %c0_i32 = arith.constant 0 : i32
    %c0_i32_0 = arith.constant 0 : i32
    %c0_i32_1 = arith.constant 0 : i32
    return %c0_i32, %c0_i32_0 : i32, i32
  }
  func.func @transform_8(%arg0: i32, %arg1: i32) -> (i32, i32) {
    %c0_i32 = arith.constant 0 : i32
    %c0_i32_0 = arith.constant 0 : i32
    %c0_i32_1 = arith.constant 0 : i32
    return %c0_i32, %c0_i32_0 : i32, i32
  }
  func.func @transform_9(%arg0: i32, %arg1: i32) -> (i32, i32) {
    %c0_i32 = arith.constant 0 : i32
    %c0_i32_0 = arith.constant 0 : i32
    %c0_i32_1 = arith.constant 0 : i32
    return %c0_i32, %c0_i32_0 : i32, i32
  }
  func.func @transform_10(%arg0: i32, %arg1: i32) -> (i32, i32, i32) {
    %c0_i32 = arith.constant 0 : i32
    %c0_i32_0 = arith.constant 0 : i32
    return %arg0, %arg1, %c0_i32 : i32, i32, i32
  }
  func.func @transform_11(%arg0: i32, %arg1: i32) -> (i32, i32, i32) {
    %c0_i32 = arith.constant 0 : i32
    %c0_i32_0 = arith.constant 0 : i32
    return %arg0, %arg1, %c0_i32 : i32, i32, i32
  }
}

module attributes {stable_mosaic.version = 11 : i64} {
  func.func @kernel(%arg0: i32, %arg1: i32, %arg2: memref<1x8x32xf32, #tpu.memory_space<vmem>>, %arg3: memref<1x8x32xbf16, #tpu.memory_space<vmem>>, %arg4: memref<32x128xbf16, #tpu.memory_space<vmem>>, %arg5: memref<1x128xf32, #tpu.memory_space<vmem>>, %arg6: memref<128x32xbf16, #tpu.memory_space<vmem>>, %arg7: memref<1x32xf32, #tpu.memory_space<vmem>>, %arg8: memref<1x32xf32, #tpu.memory_space<vmem>>, %arg9: memref<1x32xf32, #tpu.memory_space<vmem>>, %arg10: memref<1x32xf32, #tpu.memory_space<vmem>>, %arg11: memref<1x32xf32, #tpu.memory_space<vmem>>, %arg12: memref<1x8x32xf32, #tpu.memory_space<vmem>>, %arg13: memref<1x8x8xbf16, #tpu.memory_space<vmem>>) attributes {dimension_semantics = [#tpu.dimension_semantics<parallel>, #tpu.dimension_semantics<parallel>], iteration_bounds = array<i64: 2, 1>, scalar_prefetch = 0 : i64, scratch_operands = 0 : i64, tpu.core_type = #tpu.core_type<tc>, window_params = [{transform_indices = @transform_0, window_bounds = array<i64: 1, 8, 32>}, {transform_indices = @transform_1, window_bounds = array<i64: 1, 8, 32>}, {pipeline_mode = #tpu.pipeline_mode<synchronous>, transform_indices = @transform_2, window_bounds = array<i64: 32, 128>}, {pipeline_mode = #tpu.pipeline_mode<synchronous>, transform_indices = @transform_3, window_bounds = array<i64: 1, 128>}, {pipeline_mode = #tpu.pipeline_mode<synchronous>, transform_indices = @transform_4, window_bounds = array<i64: 128, 32>}, {pipeline_mode = #tpu.pipeline_mode<synchronous>, transform_indices = @transform_5, window_bounds = array<i64: 1, 32>}, {pipeline_mode = #tpu.pipeline_mode<synchronous>, transform_indices = @transform_6, window_bounds = array<i64: 1, 32>}, {pipeline_mode = #tpu.pipeline_mode<synchronous>, transform_indices = @transform_7, window_bounds = array<i64: 1, 32>}, {pipeline_mode = #tpu.pipeline_mode<synchronous>, transform_indices = @transform_8, window_bounds = array<i64: 1, 32>}, {pipeline_mode = #tpu.pipeline_mode<synchronous>, transform_indices = @transform_9, window_bounds = array<i64: 1, 32>}, {transform_indices = @transform_10, window_bounds = array<i64: 1, 8, 32>}, {transform_indices = @transform_11, window_bounds = array<i64: 1, 8, 8>}]} {
    %c0 = arith.constant 0 : index
    %c0_0 = arith.constant 0 : index
    %c0_1 = arith.constant 0 : index
    %0 = vector.load %arg2[%c0, %c0_0, %c0_1] : memref<1x8x32xf32, #tpu.memory_space<vmem>>, vector<1x8x32xf32>
    %1 = vector.shape_cast %0 : vector<1x8x32xf32> to vector<8x32xf32>
    %c0_2 = arith.constant 0 : index
    %c0_3 = arith.constant 0 : index
    %c0_4 = arith.constant 0 : index
    %2 = vector.load %arg3[%c0_2, %c0_3, %c0_4] : memref<1x8x32xbf16, #tpu.memory_space<vmem>>, vector<1x8x32xbf16>
    %3 = vector.shape_cast %2 : vector<1x8x32xbf16> to vector<8x32xbf16>
    %cst = arith.constant 3.200000e+01 : f32
    %4 = math.sqrt %cst : f32
    %cst_5 = arith.constant 1.000000e+00 : f32
    %5 = arith.divf %cst_5, %4 : f32
    %6 = arith.truncf %1 : vector<8x32xf32> to vector<8x32xbf16>
    %cst_6 = arith.constant dense<0.000000e+00> : vector<8x8xf32>
    %7 = tpu.matmul %6, %3, %cst_6 {dimension_numbers = #tpu.dot_dimension_numbers<[1], [1], [0], [0], [0, 0, 1, 0], [], []>} : vector<8x32xbf16>, vector<8x32xbf16>, vector<8x8xf32> -> vector<8x8xf32>
    %8 = vector.broadcast %5 : f32 to vector<8x8xf32>
    %9 = arith.mulf %7, %8 : vector<8x8xf32>
    %cst_7 = arith.constant dense<0xFF800000> : vector<8xf32>
    %10 = vector.multi_reduction <maximumf>, %9, %cst_7 [1] : vector<8x8xf32> to vector<8xf32>
    %11 = vector.shape_cast %10 : vector<8xf32> to vector<8x1xf32>
    %12 = vector.broadcast %11 : vector<8x1xf32> to vector<8x8xf32>
    %13 = arith.subf %9, %12 : vector<8x8xf32>
    %14 = math.exp %13 : vector<8x8xf32>
    %cst_8 = arith.constant dense<0.000000e+00> : vector<8xf32>
    %15 = vector.multi_reduction <add>, %14, %cst_8 [1] : vector<8x8xf32> to vector<8xf32>
    %16 = vector.shape_cast %15 : vector<8xf32> to vector<8x1xf32>
    %17 = tpu.reciprocal %16 {approx = true} : vector<8x1xf32> -> vector<8x1xf32>
    %18 = vector.broadcast %17 : vector<8x1xf32> to vector<8x8xf32>
    %19 = arith.mulf %14, %18 : vector<8x8xf32>
    %20 = arith.truncf %19 : vector<8x8xf32> to vector<8x8xbf16>
    %cst_9 = arith.constant dense<0.000000e+00> : vector<8x32xf32>
    %21 = tpu.matmul %20, %3, %cst_9 {dimension_numbers = #tpu.dot_dimension_numbers<[1], [0], [0], [1], [0, 0, 1, 1], [], []>} : vector<8x8xbf16>, vector<8x32xbf16>, vector<8x32xf32> -> vector<8x32xf32>
    %22 = arith.addf %1, %21 : vector<8x32xf32>
    %c0_10 = arith.constant 0 : index
    %c0_11 = arith.constant 0 : index
    %23 = vector.load %arg8[%c0_10, %c0_11] : memref<1x32xf32, #tpu.memory_space<vmem>>, vector<1x32xf32>
    %24 = vector.shape_cast %23 : vector<1x32xf32> to vector<32xf32>
    %c0_12 = arith.constant 0 : index
    %c0_13 = arith.constant 0 : index
    %25 = vector.load %arg9[%c0_12, %c0_13] : memref<1x32xf32, #tpu.memory_space<vmem>>, vector<1x32xf32>
    %26 = vector.shape_cast %25 : vector<1x32xf32> to vector<32xf32>
    %cst_14 = arith.constant dense<0.000000e+00> : vector<8xf32>
    %27 = vector.multi_reduction <add>, %22, %cst_14 [1] : vector<8x32xf32> to vector<8xf32>
    %28 = vector.shape_cast %27 : vector<8xf32> to vector<8x1xf32>
    %cst_15 = arith.constant 3.200000e+01 : f32
    %29 = vector.broadcast %cst_15 : f32 to vector<8x1xf32>
    %30 = arith.divf %28, %29 : vector<8x1xf32>
    %31 = vector.broadcast %30 : vector<8x1xf32> to vector<8x32xf32>
    %32 = arith.subf %22, %31 : vector<8x32xf32>
    %33 = arith.mulf %32, %32 : vector<8x32xf32>
    %cst_16 = arith.constant dense<0.000000e+00> : vector<8xf32>
    %34 = vector.multi_reduction <add>, %33, %cst_16 [1] : vector<8x32xf32> to vector<8xf32>
    %35 = vector.shape_cast %34 : vector<8xf32> to vector<8x1xf32>
    %cst_17 = arith.constant 3.200000e+01 : f32
    %36 = vector.broadcast %cst_17 : f32 to vector<8x1xf32>
    %37 = arith.divf %35, %36 : vector<8x1xf32>
    %38 = vector.broadcast %30 : vector<8x1xf32> to vector<8x32xf32>
    %39 = arith.subf %22, %38 : vector<8x32xf32>
    %cst_18 = arith.constant 9.99999974E-6 : f32
    %40 = vector.broadcast %cst_18 : f32 to vector<8x1xf32>
    %41 = arith.addf %37, %40 : vector<8x1xf32>
    %42 = math.rsqrt %41 : vector<8x1xf32>
    %43 = vector.broadcast %42 : vector<8x1xf32> to vector<8x32xf32>
    %44 = arith.mulf %39, %43 : vector<8x32xf32>
    %45 = vector.shape_cast %24 : vector<32xf32> to vector<1x32xf32>
    %46 = vector.broadcast %45 : vector<1x32xf32> to vector<8x32xf32>
    %47 = arith.mulf %44, %46 : vector<8x32xf32>
    %48 = vector.shape_cast %26 : vector<32xf32> to vector<1x32xf32>
    %49 = vector.broadcast %48 : vector<1x32xf32> to vector<8x32xf32>
    %50 = arith.addf %47, %49 : vector<8x32xf32>
    %51 = arith.truncf %50 : vector<8x32xf32> to vector<8x32xbf16>
    %c0_19 = arith.constant 0 : index
    %c0_20 = arith.constant 0 : index
    %52 = vector.load %arg4[%c0_19, %c0_20] : memref<32x128xbf16, #tpu.memory_space<vmem>>, vector<32x128xbf16>
    %cst_21 = arith.constant dense<0.000000e+00> : vector<8x128xf32>
    %53 = tpu.matmul %51, %52, %cst_21 {dimension_numbers = #tpu.dot_dimension_numbers<[1], [0], [0], [1], [0, 0, 1, 1], [], []>} : vector<8x32xbf16>, vector<32x128xbf16>, vector<8x128xf32> -> vector<8x128xf32>
    %c0_22 = arith.constant 0 : index
    %c0_23 = arith.constant 0 : index
    %54 = vector.load %arg5[%c0_22, %c0_23] : memref<1x128xf32, #tpu.memory_space<vmem>>, vector<1x128xf32>
    %55 = vector.shape_cast %54 : vector<1x128xf32> to vector<128xf32>
    %56 = vector.shape_cast %55 : vector<128xf32> to vector<1x128xf32>
    %57 = vector.broadcast %56 : vector<1x128xf32> to vector<8x128xf32>
    %58 = arith.addf %53, %57 : vector<8x128xf32>
    %cst_24 = arith.constant 0.000000e+00 : f32
    %59 = vector.broadcast %cst_24 : f32 to vector<8x128xf32>
    %60 = arith.maximumf %58, %59 : vector<8x128xf32>
    %61 = arith.truncf %60 : vector<8x128xf32> to vector<8x128xbf16>
    %c0_25 = arith.constant 0 : index
    %c0_26 = arith.constant 0 : index
    %62 = vector.load %arg6[%c0_25, %c0_26] : memref<128x32xbf16, #tpu.memory_space<vmem>>, vector<128x32xbf16>
    %cst_27 = arith.constant dense<0.000000e+00> : vector<8x32xf32>
    %63 = tpu.matmul %61, %62, %cst_27 {dimension_numbers = #tpu.dot_dimension_numbers<[1], [0], [0], [1], [0, 0, 1, 1], [], []>} : vector<8x128xbf16>, vector<128x32xbf16>, vector<8x32xf32> -> vector<8x32xf32>
    %c0_28 = arith.constant 0 : index
    %c0_29 = arith.constant 0 : index
    %64 = vector.load %arg7[%c0_28, %c0_29] : memref<1x32xf32, #tpu.memory_space<vmem>>, vector<1x32xf32>
    %65 = vector.shape_cast %64 : vector<1x32xf32> to vector<32xf32>
    %66 = vector.shape_cast %65 : vector<32xf32> to vector<1x32xf32>
    %67 = vector.broadcast %66 : vector<1x32xf32> to vector<8x32xf32>
    %68 = arith.addf %63, %67 : vector<8x32xf32>
    %69 = arith.addf %50, %68 : vector<8x32xf32>
    %c0_30 = arith.constant 0 : index
    %c0_31 = arith.constant 0 : index
    %70 = vector.load %arg10[%c0_30, %c0_31] : memref<1x32xf32, #tpu.memory_space<vmem>>, vector<1x32xf32>
    %71 = vector.shape_cast %70 : vector<1x32xf32> to vector<32xf32>
    %c0_32 = arith.constant 0 : index
    %c0_33 = arith.constant 0 : index
    %72 = vector.load %arg11[%c0_32, %c0_33] : memref<1x32xf32, #tpu.memory_space<vmem>>, vector<1x32xf32>
    %73 = vector.shape_cast %72 : vector<1x32xf32> to vector<32xf32>
    %cst_34 = arith.constant dense<0.000000e+00> : vector<8xf32>
    %74 = vector.multi_reduction <add>, %69, %cst_34 [1] : vector<8x32xf32> to vector<8xf32>
    %75 = vector.shape_cast %74 : vector<8xf32> to vector<8x1xf32>
    %cst_35 = arith.constant 3.200000e+01 : f32
    %76 = vector.broadcast %cst_35 : f32 to vector<8x1xf32>
    %77 = arith.divf %75, %76 : vector<8x1xf32>
    %78 = vector.broadcast %77 : vector<8x1xf32> to vector<8x32xf32>
    %79 = arith.subf %69, %78 : vector<8x32xf32>
    %80 = arith.mulf %79, %79 : vector<8x32xf32>
    %cst_36 = arith.constant dense<0.000000e+00> : vector<8xf32>
    %81 = vector.multi_reduction <add>, %80, %cst_36 [1] : vector<8x32xf32> to vector<8xf32>
    %82 = vector.shape_cast %81 : vector<8xf32> to vector<8x1xf32>
    %cst_37 = arith.constant 3.200000e+01 : f32
    %83 = vector.broadcast %cst_37 : f32 to vector<8x1xf32>
    %84 = arith.divf %82, %83 : vector<8x1xf32>
    %85 = vector.broadcast %77 : vector<8x1xf32> to vector<8x32xf32>
    %86 = arith.subf %69, %85 : vector<8x32xf32>
    %cst_38 = arith.constant 9.99999974E-6 : f32
    %87 = vector.broadcast %cst_38 : f32 to vector<8x1xf32>
    %88 = arith.addf %84, %87 : vector<8x1xf32>
    %89 = math.rsqrt %88 : vector<8x1xf32>
    %90 = vector.broadcast %89 : vector<8x1xf32> to vector<8x32xf32>
    %91 = arith.mulf %86, %90 : vector<8x32xf32>
    %92 = vector.shape_cast %71 : vector<32xf32> to vector<1x32xf32>
    %93 = vector.broadcast %92 : vector<1x32xf32> to vector<8x32xf32>
    %94 = arith.mulf %91, %93 : vector<8x32xf32>
    %95 = vector.shape_cast %73 : vector<32xf32> to vector<1x32xf32>
    %96 = vector.broadcast %95 : vector<1x32xf32> to vector<8x32xf32>
    %97 = arith.addf %94, %96 : vector<8x32xf32>
    %c0_39 = arith.constant 0 : index
    %c0_40 = arith.constant 0 : index
    %c0_41 = arith.constant 0 : index
    %98 = vector.load %arg12[%c0_39, %c0_40, %c0_41] : memref<1x8x32xf32, #tpu.memory_space<vmem>>, vector<1x8x32xf32>
    %99 = vector.shape_cast %98 : vector<1x8x32xf32> to vector<8x32xf32>
    %100 = vector.shape_cast %97 : vector<8x32xf32> to vector<1x8x32xf32>
    tpu.vector_store %arg12[%c0_39, %c0_40, %c0_41], %100 {strides = array<i32>} : memref<1x8x32xf32, #tpu.memory_space<vmem>>, vector<1x8x32xf32>,
    %c0_42 = arith.constant 0 : index
    %c0_43 = arith.constant 0 : index
    %c0_44 = arith.constant 0 : index
    %101 = vector.load %arg13[%c0_42, %c0_43, %c0_44] : memref<1x8x8xbf16, #tpu.memory_space<vmem>>, vector<1x8x8xbf16>
    %102 = vector.shape_cast %101 : vector<1x8x8xbf16> to vector<8x8xbf16>
    %103 = vector.shape_cast %20 : vector<8x8xbf16> to vector<1x8x8xbf16>
    tpu.vector_store %arg13[%c0_42, %c0_43, %c0_44], %103 {strides = array<i32>} : memref<1x8x8xbf16, #tpu.memory_space<vmem>>, vector<1x8x8xbf16>,
    return
  }
  func.func @transform_0(%arg0: i32, %arg1: i32) -> (i32, i32, i32) {
    %c0_i32 = arith.constant 0 : i32
    %c0_i32_0 = arith.constant 0 : i32
    return %arg0, %arg1, %c0_i32 : i32, i32, i32
  }
  func.func @transform_1(%arg0: i32, %arg1: i32) -> (i32, i32, i32) {
    %c0_i32 = arith.constant 0 : i32
    %c0_i32_0 = arith.constant 0 : i32
    %c0_i32_1 = arith.constant 0 : i32
    return %arg0, %c0_i32, %c0_i32_0 : i32, i32, i32
  }
  func.func @transform_2(%arg0: i32, %arg1: i32) -> (i32, i32) {
    %c0_i32 = arith.constant 0 : i32
    %c0_i32_0 = arith.constant 0 : i32
    %c0_i32_1 = arith.constant 0 : i32
    return %c0_i32, %c0_i32_0 : i32, i32
  }
  func.func @transform_3(%arg0: i32, %arg1: i32) -> (i32, i32) {
    %c0_i32 = arith.constant 0 : i32
    %c0_i32_0 = arith.constant 0 : i32
    %c0_i32_1 = arith.constant 0 : i32
    return %c0_i32, %c0_i32_0 : i32, i32
  }
  func.func @transform_4(%arg0: i32, %arg1: i32) -> (i32, i32) {
    %c0_i32 = arith.constant 0 : i32
    %c0_i32_0 = arith.constant 0 : i32
    %c0_i32_1 = arith.constant 0 : i32
    return %c0_i32, %c0_i32_0 : i32, i32
  }
  func.func @transform_5(%arg0: i32, %arg1: i32) -> (i32, i32) {
    %c0_i32 = arith.constant 0 : i32
    %c0_i32_0 = arith.constant 0 : i32
    %c0_i32_1 = arith.constant 0 : i32
    return %c0_i32, %c0_i32_0 : i32, i32
  }
  func.func @transform_6(%arg0: i32, %arg1: i32) -> (i32, i32) {
    %c0_i32 = arith.constant 0 : i32
    %c0_i32_0 = arith.constant 0 : i32
    %c0_i32_1 = arith.constant 0 : i32
    return %c0_i32, %c0_i32_0 : i32, i32
  }
  func.func @transform_7(%arg0: i32, %arg1: i32) -> (i32, i32) {
    %c0_i32 = arith.constant 0 : i32
    %c0_i32_0 = arith.constant 0 : i32
    %c0_i32_1 = arith.constant 0 : i32
    return %c0_i32, %c0_i32_0 : i32, i32
  }
  func.func @transform_8(%arg0: i32, %arg1: i32) -> (i32, i32) {
    %c0_i32 = arith.constant 0 : i32
    %c0_i32_0 = arith.constant 0 : i32
    %c0_i32_1 = arith.constant 0 : i32
    return %c0_i32, %c0_i32_0 : i32, i32
  }
  func.func @transform_9(%arg0: i32, %arg1: i32) -> (i32, i32) {
    %c0_i32 = arith.constant 0 : i32
    %c0_i32_0 = arith.constant 0 : i32
    %c0_i32_1 = arith.constant 0 : i32
    return %c0_i32, %c0_i32_0 : i32, i32
  }
  func.func @transform_10(%arg0: i32, %arg1: i32) -> (i32, i32, i32) {
    %c0_i32 = arith.constant 0 : i32
    %c0_i32_0 = arith.constant 0 : i32
    return %arg0, %arg1, %c0_i32 : i32, i32, i32
  }
  func.func @transform_11(%arg0: i32, %arg1: i32) -> (i32, i32, i32) {
    %c0_i32 = arith.constant 0 : i32
    %c0_i32_0 = arith.constant 0 : i32
    return %arg0, %arg1, %c0_i32 : i32, i32, i32
  }
}

</mosaic_0001>

<bundles_post_ra>
// kernel: tpu_custom_call.1
= control target key start
LH: loop header
LB: loop body
LE: loop exit
PB: predicated region body
PF: predicated region fallthrough
CT: control target
= control target key end

     0   :  { %s1491_s0 = inlined_call_operand.vmem [shape: f32[2,8,32], index: 0, kind: input, shape index: {}]   ;;  %s1492_s1 = inlined_call_operand.vmem [shape: bf16[2,8,32], index: 1, kind: input, shape index: {}]   ;;  %s1493_s2 = inlined_call_operand.vmem [shape: bf16[32,128], index: 2, kind: input, shape index: {}]   ;;  %s1494_s3 = inlined_call_operand.vmem [shape: f32[1,128], index: 3, kind: input, shape index: {}]   ;;  %s1495_s4 = inlined_call_operand.vmem [shape: bf16[128,32], index: 4, kind: input, shape index: {}]   ;;  %s1496_s5 = inlined_call_operand.vmem [shape: f32[1,32], index: 5, kind: input, shape index: {}]   ;;  %s1497_s6 = inlined_call_operand.vmem [shape: f32[1,32], index: 6, kind: input, shape index: {}]   ;;  %s1498_s7 = inlined_call_operand.vmem [shape: f32[1,32], index: 7, kind: input, shape index: {}]   ;;  %s1499_s8 = inlined_call_operand.vmem [shape: f32[1,32], index: 8, kind: input, shape index: {}]   ;;  %s1500_s9 = inlined_call_operand.vmem [shape: f32[1,32], index: 9, kind: input, shape index: {}]   ;;  %s1501_s10 = inlined_call_operand.hbm [shape: f32[2,8,32], index: 10, kind: output, shape index: {0}]   ;;  %s1502_s11 = inlined_call_operand.hbm [shape: bf16[2,8,8], index: 11, kind: output, shape index: {1}]  }
   0x1   :  { %1503 = sst [smem:[#allocation8_spill]] %s1491_s0 }
   0x2   :  { %1504 = sst [smem:[#allocation9_spill]] %s1492_s1 }
   0x3   :  { %1505 = sst [smem:[#allocation10_spill]] %s1493_s2 }
   0x4   :  { %1506 = sst [smem:[#allocation11_spill]] %s1494_s3 }
   0x5   :  { %1507 = sst [smem:[#allocation12_spill]] %s1495_s4 }
   0x6   :  { %17 = vsyncpa [#allocation3], 0 }
   0x7   :  { %19 = vsyncpa [#allocation3 + $0x1], 0 }
   0x8   :  { %20 = vsyncpa [#allocation5], 0 }
   0x9   :  { %22 = vsyncpa [#allocation5 + $0x1], 0  ;;  %s1284_s17 = smov 0   ;;  %s1286_s18 = smov 0  }
   0xa   :  { %s1288_s19 = smov 0   ;;  %s1290_s20 = smov 0  }
   0xb   :  { %s1292_s21 = smov 0   ;;  %s1294_s22 = smov 0  }
   0xc LB: > { %s942_s23 = sadd.s32 4294967295, %s1218_s22   ;;  %s943_s24 = sadd.s32 4294967294, %s1218_s22   ;;  %s1218_s22 = sphi %s1294_s22, %s28_s22   ;;  %s1214_s21 = sphi %s1292_s21, %s1519_s21   ;;  %s1210_s20 = sphi %s1290_s20, %s1518_s20   ;;  %s1206_s19 = sphi %s1288_s19, %s1517_s19   ;;  %s1202_s18 = sphi %s1286_s18, %s1516_s18   ;;  %s1198_s17 = sphi %s1284_s17, %s1515_s17  }
   0xd   : > { %s40_s25 = sadd.s32 1, %s1214_s21  ;;  %s271_s26 = sadd.s32 1, %s1206_s19 }
   0xe   : > { %p42_p0 = scmp.ge.s32.totalorder %s40_s25, 2  ;;  %p281_p1 = scmp.ne.s32.totalorder %s1206_s19, %s1202_s18 }
   0xf   : > { %p282_p2 = scmp.eq.s32.totalorder %s942_s23, 1  ;;  %p287_p3 = scmp.ne.s32.totalorder %s1202_s18, %s1198_s17 }
  0x10   : > { %s1521_s25 = smov (%p42_p0, %s40_s25), 0  ;;  %p288_p5 = scmp.eq.s32.totalorder %s943_s24, 1 }
  0x11   : > { %p1324_p4 = por %p282_p2, %p281_p1  ;;  %s266_s28 = ssub.s32 %s1214_s21, %s1521_s25 }
  0x12   : > { %p946_p6 = scmp.ge.s32.totalorder %s1218_s22, 1  ;;  %p269_p7 = scmp.eq.s32.totalorder %s266_s28, 0 }
  0x13   : > { %p1331_p8 = por %p288_p5, %p287_p3  ;;  %p375_p9 = scmp.lt.s32.totalorder %s1218_s22, 3 }
  0x14   : > { %s1337_s30 = scalar_select %p269_p7, %s1206_s19, %s271_s26  }
  0x15   : > { %p376_p10 = pnand %p946_p6, %p375_p9 }
  0x16   : > { %p426_p11 = scmp.lt.s32.totalorder (!%p376_p10), %s1210_s20, 1  ;;  %s1510_s0 = sld [smem:[#allocation8_spill]] (!%p376_p10) }
  0x17   : > { %379 = sbr.rel (%p376_p10) target bundleno = 1772 (0x6ec), region = 60  ;;  %s1511_s1 = sld [smem:[#allocation9_spill]] (!%p376_p10) }
  0x18   : > { %s1512_s2 = sld [smem:[#allocation10_spill]] (!%p376_p10)  ;;  %s973_s26 = sshll.u32 (!%p376_p10), %s1210_s20, 6 }
  0x19   : > { %s1513_s4 = sld [smem:[#allocation12_spill]] (!%p376_p10)  ;;  %s824_s15 = scalar_lea.hbm (!%p376_p10), %s1502_s11, %s973_s26 }
  0x1a   : > { %s1514_s3 = sld [smem:[#allocation11_spill]] (!%p376_p10)  ;;  %s1222_s24 = smov (!%p376_p10), [#allocation4]  }
  0x1c   : > { %v1220_v0 = vmov 0.0   ;;  %vm1221_vm0 = vmmov 0   ;;  %s427_s12 = scalar_select %p426_p11, %s1210_s20, 1  ;;  %vm441_vm1 = vcmask 261120   ;;  %vm505_vm2 = vcmask 1043456  }
  0x1d   : > { %992 = vmatprep.subr.bf16.mxu1 %v1220_v0  ;;  %994 = vmatprep.mubr.msk.bf16.mxu1 %vm1221_vm0, %v1220_v0  ;;  %vm489_vm3 = vcmask 64512   ;;  %vm790_vm4 = vcmask 60416   ;;  %v953_v44 = vld [vmem:[%s1497_s6] ss:$0 sm:$0xff] }
  0x1e   : > { %1012 = vmatprep.subr.bf16.mxu0 %v1220_v0  ;;  %1028 = vmatprep.mubr.msk.bf16.mxu0 %vm1221_vm0, %v1220_v0  ;;  %s949_s13 = sshll.u32 %s427_s12, 3  ;;  %s950_s14 = sshll.u32 %s427_s12, 2  ;;  %v1094_v32 = vld [vmem:[%s1512_s2 + $0x8] sm:$0xff]   ;;  %v1095_v33 = vld [vmem:[%s1512_s2] sm:$0xff]  }
  0x1f   : > { %s432_s23 = scalar_lea.vmem %s1510_s0, %s949_s13  ;;  %s436_s28 = scalar_lea.vmem %s1511_s1, %s950_s14  ;;  %v1096_v34 = vld [vmem:[%s1513_s4 + $0x38] sm:$0xff]   ;;  %v1097_v35 = vld [vmem:[%s1513_s4 + $0x30] sm:$0xff]   ;;  %v1098_v36 = vld [vmem:[%s1513_s4 + $0x28] sm:$0xff]  }
  0x20   : > { %v439_v1 = vld [vmem:[%s436_s28] sm:$0xf]  ;;  %s1362_s12 = sand.u32 1, %s1202_s18   ;;  %1013 = vmatpush3.bf16.msra.mxu0 %v1096_v34  ;;  %v1100_v38 = vld [vmem:[%s1513_s4 + $0x18] sm:$0xff]   ;;  %v1101_v39 = vld [vmem:[%s1513_s4 + $0x10] sm:$0xff]   ;;  %s1116_s1 = sshll.u32 %s1222_s24, 4  ;;  %s1117_s1 = int_to_ptr.vmem [resolvable:$false] %s1116_s1 }
  0x21   : > { %v438_v2 = vld [vmem:[%s432_s23] sm:$0xff]  ;;  %v446_v3 = vsel %vm441_vm1, %v439_v1, 0  ;;  %v506_v5 = vsel %vm505_vm2, %v439_v1, 0  ;;  %s948_s13 = sshll.u32 %s1362_s12, 2  ;;  %1014 = vmatprep.subr.bf16.mxu0 %v1220_v0  ;;  %v1102_v50 = vld [vmem:[%s1513_s4 + $0x8] sm:$0xff]   ;;  %s798_s16 = scalar_lea.sflag [#allocation5], %s1362_s12 }
  0x22   : > { %993 = vmatpush3.bf16.xpose.msra.mxu1 %v446_v3  ;;  %v440_v4 = vpack.c.bf16 %v438_v2, %v438_v2  ;;  %s1366_s14 = scalar_lea.vmem [#allocation4], %s948_s13  ;;  %v1099_v37 = vld [vmem:[%s1513_s4 + $0x20] sm:$0xff]   ;;  %s1118_s2 = scalar_lea.vmem %s1117_s1, 128 }
  0x23   : > { %998 = vmatprep.subr.bf16.mxu1 %v1220_v0  ;;  %v954_v46 = vld [vmem:[%s1498_s7] ss:$0 sm:$0xff]  ;;  %s826_s0 = sshll.u32 %s1366_s14, 4  ;;  %s827_s0 = int_to_ptr.vmem [resolvable:$true] %s826_s0 }
  0x24   : > { %1015 = vmatpush3.bf16.msra.mxu0 %v1097_v35  ;;  %v1103_v51 = vld [vmem:[%s1513_s4] sm:$0xff]   ;;  %s1112_s23 = scalar_lea.vmem %s827_s0, 64  ;;  %p1119_p1 = scmp.lt.s32.totalorder %s827_s0, %s1117_s1 }
  0x25   : > { %1016 = vmatprep.subr.bf16.mxu0 %v1220_v0  ;;  %v955_v52 = vld [vmem:[%s1514_s3] ss:$0 sm:$0xff]  ;;  %p1113_p12 = scmp.ne.s32.totalorder %s827_s0, %s1112_s23  ;;  %p1120_p2 = scmp.lt.s32.totalorder %s1118_s2, %s1112_s23 }
  0x26   : > { %v959_v60 = vld [vmem:[%s1496_s5] ss:$0 sm:$0xff] }
  0x27   : > { %p1114_p13 = pnand %p1113_p12, %p1324_p4  ;;  %p1121_p3 = por %p1120_p2, %p1119_p1 }
  0x28   : > { %1017 = vmatpush3.bf16.msra.mxu0 %v1098_v36 }
  0x29   : > { %995 = vmatmul.mubr.msk.bf16.vlgmr.msra.gmra.mxu1 %vm441_vm1, %v440_v4  ;;  %1018 = vmatprep.subr.bf16.mxu0 %v1220_v0  ;;  %p1115_p0 = pneg %p1114_p13 }
  0x2a   : > { %999 = vmatpush3.bf16.msra.mxu1 %v506_v5  ;;  %1000 = vmatprep.mubr.msk.bf16.mxu1 %vm1221_vm0, %v1220_v0 }
  0x2b   : > { %1004 = vmatprep.subr.bf16.mxu1 %v1220_v0  ;;  %p1122_p5 = pnand %p1121_p3, %p1115_p0 }
  0x2c   : > { %1019 = vmatpush3.bf16.msra.mxu0 %v1099_v37 }
  0x2d   : > { %1020 = vmatprep.subr.bf16.mxu0 %v1220_v0 }
  0x30   : > { %1021 = vmatpush3.bf16.msra.mxu0 %v1100_v38 }
  0x31   : > { %1022 = vmatprep.subr.bf16.mxu0 %v1220_v0 }
  0x34   : > { %1023 = vmatpush3.bf16.msra.mxu0 %v1101_v39 }
  0x35   : > { %1024 = vmatprep.subr.bf16.mxu0 %v1220_v0 }
  0x38   : > { %1025 = vmatpush3.bf16.msra.mxu0 %v1102_v50 }
  0x39   : > { %1026 = vmatprep.subr.bf16.mxu0 %v1220_v0 }
  0x3c   : > { %1027 = vmatpush3.bf16.msra.mxu0 %v1103_v51 }
  0xe9   : > { %v482_v6 = vpop.f32.mrf.mxu1 }
  0xea   : > { %v488_v7 = vmul.f32 0.17677669, %v482_v6 }
  0xeb   : > { %v996_v8 = vpop.f32.mrf.mxu1 }
  0xec   : > { %v490_v9 = vsel %vm489_vm3, %v488_v7, -inf }
  0xed   : > { %491 = vmax.xlane.f32.xlu0 %v490_v9  ;;  %v485_v10 = vpop.f32.mrf.mxu1 }
  0xef   : > { %v997_v11 = vpop.f32.mrf.mxu1 }
 0x176   : > { %v492_v12 = vpop.xlane.xlu0 %491 }
 0x177   : > { %v493_v13 = vsub.f32 %v488_v7, %v492_v12 }
 0x179   : > { %v494_v14 = vmul.f32 1.442695, %v493_v13 }
 0x17b   : > { %1104 = vpow2.f32 %v494_v14 }
 0x188   : > { %v1105_v15 = vpop.eup %1104 }
 0x189   : > { %v496_v16 = vsel %vm489_vm3, %v1105_v15, 0.0 }
 0x18a   : > { %497 = vadd.xlane.f32.xlu0 %v496_v16 }
 0x213   : > { %v498_v17 = vpop.xlane.xlu0 %497 }
 0x214   : > { %1106 = vrcp.f32 %v498_v17 }
 0x221   : > { %v1107_v18 = vpop.eup %1106 }
 0x222   : > { %v500_v19 = vmul.f32 %v1107_v18, %v1105_v15 }
 0x224   : > { %v501_v20 = vpack.c.bf16 %v500_v19, %v500_v19 }
 0x226   : > { %1001 = vmatmul.mubr.msk.bf16.vlgmr.msra.gmra.mxu1 %vm489_vm3, %v501_v20  ;;  %791 = vst.msk [vmem:[%s1366_s14] sm:$0xf] %vm790_vm4, %v501_v20 }
 0x227   : > { %1008 = vmatprep.mubr.msk.bf16.mxu1 %vm1221_vm0, %v1220_v0  ;;  %1005 = vmatpush3.bf16.msra.mxu1 %v1094_v32 }
 0x228   : > { %1006 = vmatprep.subr.bf16.mxu1 %v1220_v0 }
 0x22b   : > { %1007 = vmatpush3.bf16.msra.mxu1 %v1095_v33 }
 0x2e6   : > { %v542_v21 = vpop.f32.mrf.mxu1 }
 0x2e7   : > { %v548_v22 = vadd.f32 %v542_v21, %v438_v2 }
 0x2e8   : > { %v1002_v23 = vpop.f32.mrf.mxu1 }
 0x2e9   : > { %v551_v24 = vsel %vm441_vm1, %v548_v22, 0.0 }
 0x2ea   : > { %552 = vadd.xlane.f32.xlu1 %v551_v24  ;;  %v545_v25 = vpop.f32.mrf.mxu1 }
 0x2ec   : > { %v1003_v26 = vpop.f32.mrf.mxu1 }
 0x373   : > { %v553_v27 = vpop.xlane.xlu1 %552 }
 0x374   : > { %v555_v28 = vmul.f32 0.03125, %v553_v27 }
 0x376   : > { %v556_v29 = vsub.f32 %v548_v22, %v555_v28 }
 0x378   : > { %v557_v30 = vmul.f32 %v556_v29, %v556_v29 }
 0x37a   : > { %v558_v31 = vsel %vm441_vm1, %v557_v30, 0.0 }
 0x37b   : > { %559 = vadd.xlane.f32.xlu1 %v558_v31 }
 0x404   : > { %v560_v40 = vpop.xlane.xlu1 %559 }
 0x405   : > { %v561_v41 = vmul.f32 0.03125, %v560_v40 }
 0x407   : > { %v562_v42 = vadd.f32 1e-05, %v561_v41 }
 0x409   : > { %1108 = vrsqrt.f32 %v562_v42 }
 0x416   : > { %v1109_v43 = vpop.eup %1108 }
 0x417   : > { %v564_v45 = vmul.f32 %v1109_v43, %v556_v29 }
 0x419   : > { %v571_v47 = vmul.f32 %v953_v44, %v564_v45 }
 0x41b   : > { %v578_v48 = vadd.f32 %v954_v46, %v571_v47 }
 0x41d   : > { %v579_v49 = vpack.c.bf16 %v578_v48, %v578_v48 }
 0x41f   : > { %1009 = vmatmul.mubr.msk.bf16.vlgmr.msra.gmra.mxu1 %vm441_vm1, %v579_v49 }
 0x4df   : > { %v640_v53 = vpop.f32.mrf.mxu1 }
 0x4e0   : > { %v641_v54 = vadd.f32 %v955_v52, %v640_v53 }
 0x4e1   : > { %v1010_v55 = vpop.f32.mrf.mxu1 }
 0x4e2   : > { %v646_v56 = vmax.f32 %v641_v54, 0.0 }
 0x4e3   : > { %v643_v57 = vpop.f32.mrf.mxu1 }
 0x4e4   : > { %v647_v58 = vpack.c.bf16 %v646_v56, %v646_v56 }
 0x4e5   : > { %v1011_v59 = vpop.f32.mrf.mxu1 }
 0x4e6   : > { %1029 = vmatmul.mubr.bf16.vlgmr.msra.gmra.mxu0 %v647_v58 }
 0x5a6   : > { %v753_v61 = vpop.f32.mrf.mxu0 }
 0x5a7   : > { %v754_v62 = vadd.f32 %v959_v60, %v753_v61 }
 0x5a8   : > { %v1030_v63 = vpop.f32.mrf.mxu0 }
 0x5a9   : > { %v759_v0 = vadd.f32 %v754_v62, %v578_v48 }
 0x5aa   : > { %v756_v1 = vpop.f32.mrf.mxu0 }
 0x5ab   : > { %v762_v2 = vsel %vm441_vm1, %v759_v0, 0.0 }
 0x5ac   : > { %763 = vadd.xlane.f32.xlu0 %v762_v2  ;;  %v1031_v3 = vpop.f32.mrf.mxu0 }
 0x635   : > { %v764_v4 = vpop.xlane.xlu0 %763 }
 0x636   : > { %v765_v5 = vmul.f32 0.03125, %v764_v4 }
 0x638   : > { %v766_v6 = vsub.f32 %v759_v0, %v765_v5 }
 0x63a   : > { %v767_v7 = vmul.f32 %v766_v6, %v766_v6 }
 0x63c   : > { %v768_v8 = vsel %vm441_vm1, %v767_v7, 0.0 }
 0x63d   : > { %769 = vadd.xlane.f32.xlu1 %v768_v8 }
 0x63e   : > { %1125 = shalt.err (!%p1122_p5)
}
 0x63f   : > { %s1126_s14 = scalar_lea.hbm %s824_s15, 64  ;;  %s1130_s13 = scalar_lea.hbm %s1502_s11, 128 }
 0x640   : > { %p1127_p6 = scmp.ne.s32.totalorder %s824_s15, %s1126_s14  ;;  %p1131_p10 = scmp.lt.s32.totalorder %s824_s15, %s1502_s11 }
 0x641   : > { %p1132_p11 = scmp.lt.s32.totalorder %s1130_s13, %s1126_s14 }
 0x642   : > { %p1128_p7 = pnand %p1127_p6, %p1324_p4 }
 0x643   : > { %p1133_p12 = por %p1132_p11, %p1131_p10 }
 0x644   : > { %p1129_p9 = pneg %p1128_p7 }
 0x646   : > { %p1134_p13 = pnand %p1133_p12, %p1129_p9 }
 0x648   : > { %1137 = shalt.err (!%p1134_p13)
}
 0x649   : > { %1033 = dma.vmem_to_hbm [thread:$0]  (%p1324_p4), %s827_s0, 64, %s824_s15, %s798_s16   ;;  %v968_v13 = vld [vmem:[%s1499_s8] ss:$0 sm:$0xff] }
 0x64a   : > { %s947_s1 = sshll.u32 %s1362_s12, 3  ;;  %v969_v15 = vld [vmem:[%s1500_s9] ss:$0 sm:$0xff]  ;;  %s972_s24 = sshll.u32 %s1210_s20, 7 }
 0x64b   : > { %s418_s14 = scalar_lea.vmem [#allocation2], %s947_s1  ;;  %s810_s26 = scalar_lea.hbm %s1501_s10, %s972_s24 }
 0x64c   : > { %s812_s0 = sshll.u32 %s418_s14, 4  ;;  %s793_s28 = scalar_lea.sflag [#allocation3], %s1362_s12  ;;  %s813_s0 = int_to_ptr.vmem [resolvable:$true] %s812_s0 }
 0x64d   : > { %s1138_s13 = scalar_lea.vmem %s813_s0, 128  ;;  %s1223_s2 = smov [#allocation2]  }
 0x64e   : > { %p1139_p0 = scmp.ne.s32.totalorder %s813_s0, %s1138_s13  ;;  %s1142_s3 = sshll.u32 %s1223_s2, 4  ;;  %s1143_s3 = int_to_ptr.vmem [resolvable:$false] %s1142_s3 }
 0x64f   : > { %s1144_s20 = scalar_lea.vmem %s1143_s3, 256  ;;  %p1145_p3 = scmp.lt.s32.totalorder %s813_s0, %s1143_s3 }
 0x650   : > { %p1140_p1 = pnand %p1139_p0, %p1324_p4  ;;  %p1146_p5 = scmp.lt.s32.totalorder %s1144_s20, %s1138_s13 }
 0x652   : > { %p1141_p2 = pneg %p1140_p1  ;;  %p1147_p6 = por %p1146_p5, %p1145_p3 }
 0x654   : > { %p1148_p7 = pnand %p1147_p6, %p1141_p2 }
 0x6c6   : > { %v770_v9 = vpop.xlane.xlu1 %769 }
 0x6c7   : > { %v771_v10 = vmul.f32 0.03125, %v770_v9 }
 0x6c9   : > { %v772_v11 = vadd.f32 1e-05, %v771_v10 }
 0x6cb   : > { %1110 = vrsqrt.f32 %v772_v11 }
 0x6d8   : > { %v1111_v12 = vpop.eup %1110 }
 0x6d9   : > { %v774_v14 = vmul.f32 %v1111_v12, %v766_v6 }
 0x6db   : > { %v781_v16 = vmul.f32 %v968_v13, %v774_v14 }
 0x6dd   : > { %v788_v17 = vadd.f32 %v969_v15, %v781_v16 }
 0x6df   : > { %789 = vst.msk [vmem:[%s418_s14] sm:$0xff] %vm441_vm1, %v788_v17 }
 0x6e0   : > { %1151 = shalt.err (!%p1148_p7)
}
 0x6e1   : > { %s1152_s1 = scalar_lea.hbm %s810_s26, 128  ;;  %s1156_s23 = scalar_lea.hbm %s1501_s10, 256 }
 0x6e2   : > { %p1153_p9 = scmp.ne.s32.totalorder %s810_s26, %s1152_s1  ;;  %p1157_p12 = scmp.lt.s32.totalorder %s810_s26, %s1501_s10 }
 0x6e3   : > { %p1158_p13 = scmp.lt.s32.totalorder %s1156_s23, %s1152_s1 }
 0x6e4   : > { %p1154_p10 = pnand %p1153_p9, %p1324_p4 }
 0x6e5   : > { %p1159_p0 = por %p1158_p13, %p1157_p12 }
 0x6e6   : > { %p1155_p11 = pneg %p1154_p10 }
 0x6e8   : > { %p1160_p1 = pnand %p1159_p0, %p1155_p11 }
 0x6ea   : > { %1163 = shalt.err (!%p1160_p1)
}
 0x6eb   : > { %1032 = dma.vmem_to_hbm [thread:$0]  (%p1324_p4), %s813_s0, 128, %s810_s26, %s793_s28  }
 0x6ec PF: > { %p1043_p2 = scmp.ge.s32.totalorder %s1218_s22, 2  ;;  %s838_s15 = sand.u32 1, %s1198_s17  }
 0x6ed   : > { %s839_s16 = scalar_lea.sflag [#allocation3], %s838_s15 }
 0x6ee   : > { %p1037_p3 = pnand %p1043_p2, %p1331_p8 }
 0x6f0   : > { %p1038_p5 = pneg %p1037_p3 }
 0x6f2   : > { %1189 = dma.done.wait (%p1038_p5), %s839_s16, 128  }
 0x6f3   : > { %1191 = vsyncadd (%p1038_p5), %s839_s16, 4294967168  ;;  %s848_s13 = scalar_lea.sflag [#allocation5], %s838_s15 }
 0x6f4   : > { %1193 = dma.done.wait (%p1038_p5), %s848_s13, 64  }
 0x6f5   : > { %1195 = vsyncadd (%p1038_p5), %s848_s13, 4294967232  ;;  %s28_s22 = sadd.s32 1, %s1218_s22   ;;  %s1515_s17 = smov %s1202_s18 }
 0x6f6   : > { %p25_p6 = scmp.ge.s32.totalorder %s28_s22, 4   ;;  %s1516_s18 = smov %s1206_s19 }
 0x6f7   : > { %s1517_s19 = smov %s1337_s30  ;;  %s1518_s20 = smov %s1214_s21 }
 0x6f8   : > { %s1519_s21 = smov %s1521_s25  ;;  %27 = sbr.rel (!%p25_p6) target bundleno = 12 (0xc), region = 115 }
 0x6fd   :  { %853 = vsyncpa [#allocation3], 1 }
 0x6fe   :  { %855 = vsyncpa [#allocation3 + $0x1], 1 }
 0x6ff   :  { %856 = vsyncpa [#allocation5], 1 }
 0x700   :  { %858 = vsyncpa [#allocation5 + $0x1], 1 }

// kernel: tpu_custom_call.1
= control target key start
LH: loop header
LB: loop body
LE: loop exit
PB: predicated region body
PF: predicated region fallthrough
CT: control target
= control target key end

     0   :  { %s1491_s0 = inlined_call_operand.vmem [shape: f32[2,8,32], index: 0, kind: input, shape index: {}]   ;;  %s1492_s1 = inlined_call_operand.vmem [shape: bf16[2,8,32], index: 1, kind: input, shape index: {}]   ;;  %s1493_s2 = inlined_call_operand.vmem [shape: bf16[32,128], index: 2, kind: input, shape index: {}]   ;;  %s1494_s3 = inlined_call_operand.vmem [shape: f32[1,128], index: 3, kind: input, shape index: {}]   ;;  %s1495_s4 = inlined_call_operand.vmem [shape: bf16[128,32], index: 4, kind: input, shape index: {}]   ;;  %s1496_s5 = inlined_call_operand.vmem [shape: f32[1,32], index: 5, kind: input, shape index: {}]   ;;  %s1497_s6 = inlined_call_operand.vmem [shape: f32[1,32], index: 6, kind: input, shape index: {}]   ;;  %s1498_s7 = inlined_call_operand.vmem [shape: f32[1,32], index: 7, kind: input, shape index: {}]   ;;  %s1499_s8 = inlined_call_operand.vmem [shape: f32[1,32], index: 8, kind: input, shape index: {}]   ;;  %s1500_s9 = inlined_call_operand.vmem [shape: f32[1,32], index: 9, kind: input, shape index: {}]   ;;  %s1501_s10 = inlined_call_operand.hbm [shape: f32[2,8,32], index: 10, kind: output, shape index: {0}]   ;;  %s1502_s11 = inlined_call_operand.hbm [shape: bf16[2,8,8], index: 11, kind: output, shape index: {1}]  }
   0x1   :  { %1503 = sst [smem:[#allocation8_spill]] %s1491_s0 }
   0x2   :  { %1504 = sst [smem:[#allocation9_spill]] %s1492_s1 }
   0x3   :  { %1505 = sst [smem:[#allocation10_spill]] %s1493_s2 }
   0x4   :  { %1506 = sst [smem:[#allocation11_spill]] %s1494_s3 }
   0x5   :  { %1507 = sst [smem:[#allocation12_spill]] %s1495_s4 }
   0x6   :  { %17 = vsyncpa [#allocation3], 0 }
   0x7   :  { %19 = vsyncpa [#allocation3 + $0x1], 0 }
   0x8   :  { %20 = vsyncpa [#allocation5], 0 }
   0x9   :  { %22 = vsyncpa [#allocation5 + $0x1], 0  ;;  %s1284_s17 = smov 0   ;;  %s1286_s18 = smov 0  }
   0xa   :  { %s1288_s19 = smov 0   ;;  %s1290_s20 = smov 0  }
   0xb   :  { %s1292_s21 = smov 0   ;;  %s1294_s22 = smov 0  }
   0xc LB: > { %s942_s23 = sadd.s32 4294967295, %s1218_s22   ;;  %s943_s24 = sadd.s32 4294967294, %s1218_s22   ;;  %s1218_s22 = sphi %s1294_s22, %s28_s22   ;;  %s1214_s21 = sphi %s1292_s21, %s1519_s21   ;;  %s1210_s20 = sphi %s1290_s20, %s1518_s20   ;;  %s1206_s19 = sphi %s1288_s19, %s1517_s19   ;;  %s1202_s18 = sphi %s1286_s18, %s1516_s18   ;;  %s1198_s17 = sphi %s1284_s17, %s1515_s17  }
   0xd   : > { %s40_s25 = sadd.s32 1, %s1214_s21  ;;  %s271_s26 = sadd.s32 1, %s1206_s19 }
   0xe   : > { %p42_p0 = scmp.ge.s32.totalorder %s40_s25, 2  ;;  %p281_p1 = scmp.ne.s32.totalorder %s1206_s19, %s1202_s18 }
   0xf   : > { %p282_p2 = scmp.eq.s32.totalorder %s942_s23, 1  ;;  %p287_p3 = scmp.ne.s32.totalorder %s1202_s18, %s1198_s17 }
  0x10   : > { %s1521_s25 = smov (%p42_p0, %s40_s25), 0  ;;  %p288_p5 = scmp.eq.s32.totalorder %s943_s24, 1 }
  0x11   : > { %p1324_p4 = por %p282_p2, %p281_p1  ;;  %s266_s28 = ssub.s32 %s1214_s21, %s1521_s25 }
  0x12   : > { %p946_p6 = scmp.ge.s32.totalorder %s1218_s22, 1  ;;  %p269_p7 = scmp.eq.s32.totalorder %s266_s28, 0 }
  0x13   : > { %p1331_p8 = por %p288_p5, %p287_p3  ;;  %p375_p9 = scmp.lt.s32.totalorder %s1218_s22, 3 }
  0x14   : > { %s1337_s30 = scalar_select %p269_p7, %s1206_s19, %s271_s26  }
  0x15   : > { %p376_p10 = pnand %p946_p6, %p375_p9 }
  0x16   : > { %p426_p11 = scmp.lt.s32.totalorder (!%p376_p10), %s1210_s20, 1  ;;  %s1510_s0 = sld [smem:[#allocation8_spill]] (!%p376_p10) }
  0x17   : > { %379 = sbr.rel (%p376_p10) target bundleno = 1772 (0x6ec), region = 60  ;;  %s1511_s1 = sld [smem:[#allocation9_spill]] (!%p376_p10) }
  0x18   : > { %s1512_s2 = sld [smem:[#allocation10_spill]] (!%p376_p10)  ;;  %s973_s26 = sshll.u32 (!%p376_p10), %s1210_s20, 6 }
  0x19   : > { %s1513_s4 = sld [smem:[#allocation12_spill]] (!%p376_p10)  ;;  %s824_s15 = scalar_lea.hbm (!%p376_p10), %s1502_s11, %s973_s26 }
  0x1a   : > { %s1514_s3 = sld [smem:[#allocation11_spill]] (!%p376_p10)  ;;  %s1222_s24 = smov (!%p376_p10), [#allocation4]  }
  0x1c   : > { %v1220_v0 = vmov 0.0   ;;  %vm1221_vm0 = vmmov 0   ;;  %s427_s12 = scalar_select %p426_p11, %s1210_s20, 1  ;;  %vm441_vm1 = vcmask 261120   ;;  %vm505_vm2 = vcmask 1043456  }
  0x1d   : > { %992 = vmatprep.subr.bf16.mxu1 %v1220_v0  ;;  %994 = vmatprep.mubr.msk.bf16.mxu1 %vm1221_vm0, %v1220_v0  ;;  %vm489_vm3 = vcmask 64512   ;;  %vm790_vm4 = vcmask 60416   ;;  %v953_v44 = vld [vmem:[%s1497_s6] ss:$0 sm:$0xff] }
  0x1e   : > { %1012 = vmatprep.subr.bf16.mxu0 %v1220_v0  ;;  %1028 = vmatprep.mubr.msk.bf16.mxu0 %vm1221_vm0, %v1220_v0  ;;  %s949_s13 = sshll.u32 %s427_s12, 3  ;;  %s950_s14 = sshll.u32 %s427_s12, 2  ;;  %v1094_v32 = vld [vmem:[%s1512_s2 + $0x8] sm:$0xff]   ;;  %v1095_v33 = vld [vmem:[%s1512_s2] sm:$0xff]  }
  0x1f   : > { %s432_s23 = scalar_lea.vmem %s1510_s0, %s949_s13  ;;  %s436_s28 = scalar_lea.vmem %s1511_s1, %s950_s14  ;;  %v1096_v34 = vld [vmem:[%s1513_s4 + $0x38] sm:$0xff]   ;;  %v1097_v35 = vld [vmem:[%s1513_s4 + $0x30] sm:$0xff]   ;;  %v1098_v36 = vld [vmem:[%s1513_s4 + $0x28] sm:$0xff]  }
  0x20   : > { %v439_v1 = vld [vmem:[%s436_s28] sm:$0xf]  ;;  %s1362_s12 = sand.u32 1, %s1202_s18   ;;  %1013 = vmatpush3.bf16.msra.mxu0 %v1096_v34  ;;  %v1100_v38 = vld [vmem:[%s1513_s4 + $0x18] sm:$0xff]   ;;  %v1101_v39 = vld [vmem:[%s1513_s4 + $0x10] sm:$0xff]   ;;  %s1116_s1 = sshll.u32 %s1222_s24, 4  ;;  %s1117_s1 = int_to_ptr.vmem [resolvable:$false] %s1116_s1 }
  0x21   : > { %v438_v2 = vld [vmem:[%s432_s23] sm:$0xff]  ;;  %v446_v3 = vsel %vm441_vm1, %v439_v1, 0  ;;  %v506_v5 = vsel %vm505_vm2, %v439_v1, 0  ;;  %s948_s13 = sshll.u32 %s1362_s12, 2  ;;  %1014 = vmatprep.subr.bf16.mxu0 %v1220_v0  ;;  %v1102_v50 = vld [vmem:[%s1513_s4 + $0x8] sm:$0xff]   ;;  %s798_s16 = scalar_lea.sflag [#allocation5], %s1362_s12 }
  0x22   : > { %993 = vmatpush3.bf16.xpose.msra.mxu1 %v446_v3  ;;  %v440_v4 = vpack.c.bf16 %v438_v2, %v438_v2  ;;  %s1366_s14 = scalar_lea.vmem [#allocation4], %s948_s13  ;;  %v1099_v37 = vld [vmem:[%s1513_s4 + $0x20] sm:$0xff]   ;;  %s1118_s2 = scalar_lea.vmem %s1117_s1, 128 }
  0x23   : > { %998 = vmatprep.subr.bf16.mxu1 %v1220_v0  ;;  %v954_v46 = vld [vmem:[%s1498_s7] ss:$0 sm:$0xff]  ;;  %s826_s0 = sshll.u32 %s1366_s14, 4  ;;  %s827_s0 = int_to_ptr.vmem [resolvable:$true] %s826_s0 }
  0x24   : > { %1015 = vmatpush3.bf16.msra.mxu0 %v1097_v35  ;;  %v1103_v51 = vld [vmem:[%s1513_s4] sm:$0xff]   ;;  %s1112_s23 = scalar_lea.vmem %s827_s0, 64  ;;  %p1119_p1 = scmp.lt.s32.totalorder %s827_s0, %s1117_s1 }
  0x25   : > { %1016 = vmatprep.subr.bf16.mxu0 %v1220_v0  ;;  %v955_v52 = vld [vmem:[%s1514_s3] ss:$0 sm:$0xff]  ;;  %p1113_p12 = scmp.ne.s32.totalorder %s827_s0, %s1112_s23  ;;  %p1120_p2 = scmp.lt.s32.totalorder %s1118_s2, %s1112_s23 }
  0x26   : > { %v959_v60 = vld [vmem:[%s1496_s5] ss:$0 sm:$0xff] }
  0x27   : > { %p1114_p13 = pnand %p1113_p12, %p1324_p4  ;;  %p1121_p3 = por %p1120_p2, %p1119_p1 }
  0x28   : > { %1017 = vmatpush3.bf16.msra.mxu0 %v1098_v36 }
  0x29   : > { %995 = vmatmul.mubr.msk.bf16.vlgmr.msra.gmra.mxu1 %vm441_vm1, %v440_v4  ;;  %1018 = vmatprep.subr.bf16.mxu0 %v1220_v0  ;;  %p1115_p0 = pneg %p1114_p13 }
  0x2a   : > { %999 = vmatpush3.bf16.msra.mxu1 %v506_v5  ;;  %1000 = vmatprep.mubr.msk.bf16.mxu1 %vm1221_vm0, %v1220_v0 }
  0x2b   : > { %1004 = vmatprep.subr.bf16.mxu1 %v1220_v0  ;;  %p1122_p5 = pnand %p1121_p3, %p1115_p0 }
  0x2c   : > { %1019 = vmatpush3.bf16.msra.mxu0 %v1099_v37 }
  0x2d   : > { %1020 = vmatprep.subr.bf16.mxu0 %v1220_v0 }
  0x30   : > { %1021 = vmatpush3.bf16.msra.mxu0 %v1100_v38 }
  0x31   : > { %1022 = vmatprep.subr.bf16.mxu0 %v1220_v0 }
  0x34   : > { %1023 = vmatpush3.bf16.msra.mxu0 %v1101_v39 }
  0x35   : > { %1024 = vmatprep.subr.bf16.mxu0 %v1220_v0 }
  0x38   : > { %1025 = vmatpush3.bf16.msra.mxu0 %v1102_v50 }
  0x39   : > { %1026 = vmatprep.subr.bf16.mxu0 %v1220_v0 }
  0x3c   : > { %1027 = vmatpush3.bf16.msra.mxu0 %v1103_v51 }
  0xe9   : > { %v482_v6 = vpop.f32.mrf.mxu1 }
  0xea   : > { %v488_v7 = vmul.f32 0.17677669, %v482_v6 }
  0xeb   : > { %v996_v8 = vpop.f32.mrf.mxu1 }
  0xec   : > { %v490_v9 = vsel %vm489_vm3, %v488_v7, -inf }
  0xed   : > { %491 = vmax.xlane.f32.xlu0 %v490_v9  ;;  %v485_v10 = vpop.f32.mrf.mxu1 }
  0xef   : > { %v997_v11 = vpop.f32.mrf.mxu1 }
 0x176   : > { %v492_v12 = vpop.xlane.xlu0 %491 }
 0x177   : > { %v493_v13 = vsub.f32 %v488_v7, %v492_v12 }
 0x179   : > { %v494_v14 = vmul.f32 1.442695, %v493_v13 }
 0x17b   : > { %1104 = vpow2.f32 %v494_v14 }
 0x188   : > { %v1105_v15 = vpop.eup %1104 }
 0x189   : > { %v496_v16 = vsel %vm489_vm3, %v1105_v15, 0.0 }
 0x18a   : > { %497 = vadd.xlane.f32.xlu0 %v496_v16 }
 0x213   : > { %v498_v17 = vpop.xlane.xlu0 %497 }
 0x214   : > { %1106 = vrcp.f32 %v498_v17 }
 0x221   : > { %v1107_v18 = vpop.eup %1106 }
 0x222   : > { %v500_v19 = vmul.f32 %v1107_v18, %v1105_v15 }
 0x224   : > { %v501_v20 = vpack.c.bf16 %v500_v19, %v500_v19 }
 0x226   : > { %1001 = vmatmul.mubr.msk.bf16.vlgmr.msra.gmra.mxu1 %vm489_vm3, %v501_v20  ;;  %791 = vst.msk [vmem:[%s1366_s14] sm:$0xf] %vm790_vm4, %v501_v20 }
 0x227   : > { %1008 = vmatprep.mubr.msk.bf16.mxu1 %vm1221_vm0, %v1220_v0  ;;  %1005 = vmatpush3.bf16.msra.mxu1 %v1094_v32 }
 0x228   : > { %1006 = vmatprep.subr.bf16.mxu1 %v1220_v0 }
 0x22b   : > { %1007 = vmatpush3.bf16.msra.mxu1 %v1095_v33 }
 0x2e6   : > { %v542_v21 = vpop.f32.mrf.mxu1 }
 0x2e7   : > { %v548_v22 = vadd.f32 %v542_v21, %v438_v2 }
 0x2e8   : > { %v1002_v23 = vpop.f32.mrf.mxu1 }
 0x2e9   : > { %v551_v24 = vsel %vm441_vm1, %v548_v22, 0.0 }
 0x2ea   : > { %552 = vadd.xlane.f32.xlu1 %v551_v24  ;;  %v545_v25 = vpop.f32.mrf.mxu1 }
 0x2ec   : > { %v1003_v26 = vpop.f32.mrf.mxu1 }
 0x373   : > { %v553_v27 = vpop.xlane.xlu1 %552 }
 0x374   : > { %v555_v28 = vmul.f32 0.03125, %v553_v27 }
 0x376   : > { %v556_v29 = vsub.f32 %v548_v22, %v555_v28 }
 0x378   : > { %v557_v30 = vmul.f32 %v556_v29, %v556_v29 }
 0x37a   : > { %v558_v31 = vsel %vm441_vm1, %v557_v30, 0.0 }
 0x37b   : > { %559 = vadd.xlane.f32.xlu1 %v558_v31 }
 0x404   : > { %v560_v40 = vpop.xlane.xlu1 %559 }
 0x405   : > { %v561_v41 = vmul.f32 0.03125, %v560_v40 }
 0x407   : > { %v562_v42 = vadd.f32 1e-05, %v561_v41 }
 0x409   : > { %1108 = vrsqrt.f32 %v562_v42 }
 0x416   : > { %v1109_v43 = vpop.eup %1108 }
 0x417   : > { %v564_v45 = vmul.f32 %v1109_v43, %v556_v29 }
 0x419   : > { %v571_v47 = vmul.f32 %v953_v44, %v564_v45 }
 0x41b   : > { %v578_v48 = vadd.f32 %v954_v46, %v571_v47 }
 0x41d   : > { %v579_v49 = vpack.c.bf16 %v578_v48, %v578_v48 }
 0x41f   : > { %1009 = vmatmul.mubr.msk.bf16.vlgmr.msra.gmra.mxu1 %vm441_vm1, %v579_v49 }
 0x4df   : > { %v640_v53 = vpop.f32.mrf.mxu1 }
 0x4e0   : > { %v641_v54 = vadd.f32 %v955_v52, %v640_v53 }
 0x4e1   : > { %v1010_v55 = vpop.f32.mrf.mxu1 }
 0x4e2   : > { %v646_v56 = vmax.f32 %v641_v54, 0.0 }
 0x4e3   : > { %v643_v57 = vpop.f32.mrf.mxu1 }
 0x4e4   : > { %v647_v58 = vpack.c.bf16 %v646_v56, %v646_v56 }
 0x4e5   : > { %v1011_v59 = vpop.f32.mrf.mxu1 }
 0x4e6   : > { %1029 = vmatmul.mubr.bf16.vlgmr.msra.gmra.mxu0 %v647_v58 }
 0x5a6   : > { %v753_v61 = vpop.f32.mrf.mxu0 }
 0x5a7   : > { %v754_v62 = vadd.f32 %v959_v60, %v753_v61 }
 0x5a8   : > { %v1030_v63 = vpop.f32.mrf.mxu0 }
 0x5a9   : > { %v759_v0 = vadd.f32 %v754_v62, %v578_v48 }
 0x5aa   : > { %v756_v1 = vpop.f32.mrf.mxu0 }
 0x5ab   : > { %v762_v2 = vsel %vm441_vm1, %v759_v0, 0.0 }
 0x5ac   : > { %763 = vadd.xlane.f32.xlu0 %v762_v2  ;;  %v1031_v3 = vpop.f32.mrf.mxu0 }
 0x635   : > { %v764_v4 = vpop.xlane.xlu0 %763 }
 0x636   : > { %v765_v5 = vmul.f32 0.03125, %v764_v4 }
 0x638   : > { %v766_v6 = vsub.f32 %v759_v0, %v765_v5 }
 0x63a   : > { %v767_v7 = vmul.f32 %v766_v6, %v766_v6 }
 0x63c   : > { %v768_v8 = vsel %vm441_vm1, %v767_v7, 0.0 }
 0x63d   : > { %769 = vadd.xlane.f32.xlu1 %v768_v8 }
 0x63e   : > { %1125 = shalt.err (!%p1122_p5)
}
 0x63f   : > { %s1126_s14 = scalar_lea.hbm %s824_s15, 64  ;;  %s1130_s13 = scalar_lea.hbm %s1502_s11, 128 }
 0x640   : > { %p1127_p6 = scmp.ne.s32.totalorder %s824_s15, %s1126_s14  ;;  %p1131_p10 = scmp.lt.s32.totalorder %s824_s15, %s1502_s11 }
 0x641   : > { %p1132_p11 = scmp.lt.s32.totalorder %s1130_s13, %s1126_s14 }
 0x642   : > { %p1128_p7 = pnand %p1127_p6, %p1324_p4 }
 0x643   : > { %p1133_p12 = por %p1132_p11, %p1131_p10 }
 0x644   : > { %p1129_p9 = pneg %p1128_p7 }
 0x646   : > { %p1134_p13 = pnand %p1133_p12, %p1129_p9 }
 0x648   : > { %1137 = shalt.err (!%p1134_p13)
}
 0x649   : > { %1033 = dma.vmem_to_hbm [thread:$0]  (%p1324_p4), %s827_s0, 64, %s824_s15, %s798_s16   ;;  %v968_v13 = vld [vmem:[%s1499_s8] ss:$0 sm:$0xff] }
 0x64a   : > { %s947_s1 = sshll.u32 %s1362_s12, 3  ;;  %v969_v15 = vld [vmem:[%s1500_s9] ss:$0 sm:$0xff]  ;;  %s972_s24 = sshll.u32 %s1210_s20, 7 }
 0x64b   : > { %s418_s14 = scalar_lea.vmem [#allocation2], %s947_s1  ;;  %s810_s26 = scalar_lea.hbm %s1501_s10, %s972_s24 }
 0x64c   : > { %s812_s0 = sshll.u32 %s418_s14, 4  ;;  %s793_s28 = scalar_lea.sflag [#allocation3], %s1362_s12  ;;  %s813_s0 = int_to_ptr.vmem [resolvable:$true] %s812_s0 }
 0x64d   : > { %s1138_s13 = scalar_lea.vmem %s813_s0, 128  ;;  %s1223_s2 = smov [#allocation2]  }
 0x64e   : > { %p1139_p0 = scmp.ne.s32.totalorder %s813_s0, %s1138_s13  ;;  %s1142_s3 = sshll.u32 %s1223_s2, 4  ;;  %s1143_s3 = int_to_ptr.vmem [resolvable:$false] %s1142_s3 }
 0x64f   : > { %s1144_s20 = scalar_lea.vmem %s1143_s3, 256  ;;  %p1145_p3 = scmp.lt.s32.totalorder %s813_s0, %s1143_s3 }
 0x650   : > { %p1140_p1 = pnand %p1139_p0, %p1324_p4  ;;  %p1146_p5 = scmp.lt.s32.totalorder %s1144_s20, %s1138_s13 }
 0x652   : > { %p1141_p2 = pneg %p1140_p1  ;;  %p1147_p6 = por %p1146_p5, %p1145_p3 }
 0x654   : > { %p1148_p7 = pnand %p1147_p6, %p1141_p2 }
 0x6c6   : > { %v770_v9 = vpop.xlane.xlu1 %769 }
 0x6c7   : > { %v771_v10 = vmul.f32 0.03125, %v770_v9 }
 0x6c9   : > { %v772_v11 = vadd.f32 1e-05, %v771_v10 }
 0x6cb   : > { %1110 = vrsqrt.f32 %v772_v11 }
 0x6d8   : > { %v1111_v12 = vpop.eup %1110 }
 0x6d9   : > { %v774_v14 = vmul.f32 %v1111_v12, %v766_v6 }
 0x6db   : > { %v781_v16 = vmul.f32 %v968_v13, %v774_v14 }
 0x6dd   : > { %v788_v17 = vadd.f32 %v969_v15, %v781_v16 }
 0x6df   : > { %789 = vst.msk [vmem:[%s418_s14] sm:$0xff] %vm441_vm1, %v788_v17 }
 0x6e0   : > { %1151 = shalt.err (!%p1148_p7)
}
 0x6e1   : > { %s1152_s1 = scalar_lea.hbm %s810_s26, 128  ;;  %s1156_s23 = scalar_lea.hbm %s1501_s10, 256 }
 0x6e2   : > { %p1153_p9 = scmp.ne.s32.totalorder %s810_s26, %s1152_s1  ;;  %p1157_p12 = scmp.lt.s32.totalorder %s810_s26, %s1501_s10 }
 0x6e3   : > { %p1158_p13 = scmp.lt.s32.totalorder %s1156_s23, %s1152_s1 }
 0x6e4   : > { %p1154_p10 = pnand %p1153_p9, %p1324_p4 }
 0x6e5   : > { %p1159_p0 = por %p1158_p13, %p1157_p12 }
 0x6e6   : > { %p1155_p11 = pneg %p1154_p10 }
 0x6e8   : > { %p1160_p1 = pnand %p1159_p0, %p1155_p11 }
 0x6ea   : > { %1163 = shalt.err (!%p1160_p1)
}
 0x6eb   : > { %1032 = dma.vmem_to_hbm [thread:$0]  (%p1324_p4), %s813_s0, 128, %s810_s26, %s793_s28  }
 0x6ec PF: > { %p1043_p2 = scmp.ge.s32.totalorder %s1218_s22, 2  ;;  %s838_s15 = sand.u32 1, %s1198_s17  }
 0x6ed   : > { %s839_s16 = scalar_lea.sflag [#allocation3], %s838_s15 }
 0x6ee   : > { %p1037_p3 = pnand %p1043_p2, %p1331_p8 }
 0x6f0   : > { %p1038_p5 = pneg %p1037_p3 }
 0x6f2   : > { %1189 = dma.done.wait (%p1038_p5), %s839_s16, 128  }
 0x6f3   : > { %1191 = vsyncadd (%p1038_p5), %s839_s16, 4294967168  ;;  %s848_s13 = scalar_lea.sflag [#allocation5], %s838_s15 }
 0x6f4   : > { %1193 = dma.done.wait (%p1038_p5), %s848_s13, 64  }
 0x6f5   : > { %1195 = vsyncadd (%p1038_p5), %s848_s13, 4294967232  ;;  %s28_s22 = sadd.s32 1, %s1218_s22   ;;  %s1515_s17 = smov %s1202_s18 }
 0x6f6   : > { %p25_p6 = scmp.ge.s32.totalorder %s28_s22, 4   ;;  %s1516_s18 = smov %s1206_s19 }
 0x6f7   : > { %s1517_s19 = smov %s1337_s30  ;;  %s1518_s20 = smov %s1214_s21 }
 0x6f8   : > { %s1519_s21 = smov %s1521_s25  ;;  %27 = sbr.rel (!%p25_p6) target bundleno = 12 (0xc), region = 115 }
 0x6fd   :  { %853 = vsyncpa [#allocation3], 1 }
 0x6fe   :  { %855 = vsyncpa [#allocation3 + $0x1], 1 }
 0x6ff   :  { %856 = vsyncpa [#allocation5], 1 }
 0x700   :  { %858 = vsyncpa [#allocation5 + $0x1], 1 }

</bundles_post_ra>
